<compile_context>
chip_gen: v5e
topology: v5e:2x2
jax: 0.10.0
libtpu: 0.0.40
codegen_flags: <defaults>
</compile_context>

<pallas_src>
import functools

import jax
import jax.numpy as jnp
from jax.experimental import pallas as pl
from jax.experimental.pallas import tpu as pltpu

NEG_SLOPE = 0.2          # LeakyReLU negative_slope in the module
IN_EPS = 1e-5            # nn.InstanceNorm2d default eps

LANE = 128               # TPU lane width
MXU_TILE_M = 256         # matmul tile targets (multiples of MXU/vreg granularity)
MXU_TILE_N = 256
MXU_TILE_K = 512
HW_TILE = 1024           # spatial tile for the InstanceNorm kernels
VMEM_LIMIT = 48 * 1024 * 1024   # below v7x's 64 MiB physical, above all defaults


def _round_up(x, m):
    return ((x + m - 1) // m) * m


# ---------------------------------------------------------------------------
# Pallas kernel 1: tiled MXU matmul (im2col patches @ weight), f32 accumulator
# scratch, fused bias add and optional LeakyReLU epilogue.
# ---------------------------------------------------------------------------
def _matmul_bias_act_kernel(a_ref, b_ref, bias_ref, o_ref, acc_ref, *,
                            apply_bias, apply_lrelu):
    @pl.when(pl.program_id(2) == 0)
    def _():
        acc_ref[...] = jnp.zeros_like(acc_ref)

    acc_ref[...] += jnp.dot(a_ref[...], b_ref[...],
                            preferred_element_type=jnp.float32)

    @pl.when(pl.program_id(2) == pl.num_programs(2) - 1)
    def _():
        acc = acc_ref[...]                      # f32 epilogue (v5e-safe)
        if apply_bias:
            acc = acc + bias_ref[...]           # (1, tn) broadcasts over rows
        if apply_lrelu:
            acc = jnp.where(acc >= 0, acc, NEG_SLOPE * acc)
        o_ref[...] = acc.astype(o_ref.dtype)


def conv2d_pallas(x_nhwc, w_oihw, bias, *, stride, padding, apply_lrelu,
                  out_dtype=jnp.bfloat16):
    """Conv2d (PyTorch cross-correlation, zero padding), NHWC in / NHWC out.

    Output channels are padded up to a multiple of 128 (lane-dense stores);
    padded channels are exactly zero and inert under InstanceNorm/LeakyReLU
    and later convs, so they are carried through and sliced off at the end.
    """
    N, H, W, Cin = x_nhwc.shape
    Cout, Cin_w, KH, KW = w_oihw.shape
    OH = (H + 2 * padding - KH) // stride + 1
    OW = (W + 2 * padding - KW) // stride + 1

    # x may carry zero-padded channels from the previous layer; pad w to match.
    if Cin_w < Cin:
        w_oihw = jnp.pad(w_oihw, ((0, 0), (0, Cin - Cin_w), (0, 0), (0, 0)))

    x_pad = jnp.pad(x_nhwc.astype(jnp.bfloat16),
                    ((0, 0), (padding, padding), (padding, padding), (0, 0)))

    # im2col (bf16 glue, fused into the surrounding jit): K ordered (kh, kw, cin)
    patches = []
    for kh in range(KH):
        for kw in range(KW):
            patches.append(
                x_pad[:, kh:kh + stride * (OH - 1) + 1:stride,
                          kw:kw + stride * (OW - 1) + 1:stride, :])
    p = jnp.stack(patches, axis=3)               # [N, OH, OW, KH*KW, Cin]

    M = N * OH * OW
    K = KH * KW * Cin
    p = p.reshape(M, K)                          # bf16

    # Tile sizes: lane/sublane friendly and small enough that double-buffered
    # A+B+out tiles plus the f32 accumulator stay ~2 MiB (fits v5e/v6e/v7x).
    tm = min(MXU_TILE_M, _round_up(M, 16))       # 16: bf16 sublane packing
    tn = min(MXU_TILE_N, _round_up(Cout, LANE))
    tk = min(MXU_TILE_K, _round_up(K, LANE))
    M_pad = _round_up(M, tm)
    Cout_pad = _round_up(Cout, tn)
    K_pad = _round_up(K, tk)

    p = jnp.pad(p, ((0, M_pad - M), (0, K_pad - K)))

    # [Cout, Cin, KH, KW] -> [KH, KW, Cin, Cout] -> [K, Cout], bf16, zero pad.
    w_mat = jnp.transpose(w_oihw, (2, 3, 1, 0)).reshape(K, Cout)
    w_mat = jnp.pad(w_mat.astype(jnp.bfloat16),
                    ((0, K_pad - K), (0, Cout_pad - Cout)))

    apply_bias = bias is not None
    if apply_bias:
        bias_vec = jnp.pad(bias.astype(jnp.float32), (0, Cout_pad - Cout))
    else:
        bias_vec = jnp.zeros((Cout_pad,), jnp.float32)
    bias_mat = bias_vec.reshape(1, Cout_pad)

    grid = (M_pad // tm, Cout_pad // tn, K_pad // tk)
    cost = pl.CostEstimate(
        flops=2 * M_pad * K_pad * Cout_pad,
        transcendentals=0,
        bytes_accessed=2 * (M_pad * K_pad + K_pad * Cout_pad + M_pad * Cout_pad)
                       + 4 * Cout_pad)

    out = pl.pallas_call(
        functools.partial(_matmul_bias_act_kernel,
                          apply_bias=apply_bias, apply_lrelu=apply_lrelu),
        out_shape=jax.ShapeDtypeStruct((M_pad, Cout_pad), out_dtype),
        grid=grid,
        in_specs=[
            pl.BlockSpec((tm, tk), lambda i, j, k: (i, k)),
            pl.BlockSpec((tk, tn), lambda i, j, k: (k, j)),
            pl.BlockSpec((1, tn), lambda i, j, k: (0, j)),
        ],
        out_specs=pl.BlockSpec((tm, tn), lambda i, j, k: (i, j)),
        scratch_shapes=[pltpu.VMEM((tm, tn), jnp.float32)],
        compiler_params=pltpu.CompilerParams(
            dimension_semantics=("parallel", "parallel", "arbitrary"),
            vmem_limit_bytes=VMEM_LIMIT),
        cost_estimate=cost,
    )(p, w_mat, bias_mat)

    return out[:M].reshape(N, OH, OW, Cout_pad)


# ---------------------------------------------------------------------------
# Pallas kernels 2a/2b: InstanceNorm2d(affine=False) + LeakyReLU(0.2), tiled
# over the spatial axis.  Single-pass sum / sum-of-squares stats (biased var,
# matching PyTorch) accumulated in resident f32 output blocks, then a fully
# parallel normalize + activation pass.
# ---------------------------------------------------------------------------
def _instnorm_stats_kernel(x_ref, mean_ref, rstd_ref, *, inv_count):
    s = pl.program_id(1)

    @pl.when(s == 0)
    def _():
        mean_ref[...] = jnp.zeros_like(mean_ref)      # holds running sum
        rstd_ref[...] = jnp.zeros_like(rstd_ref)      # holds running sum of squares

    x = x_ref[...].astype(jnp.float32)                # (1, thw, C)
    mean_ref[...] += jnp.sum(x, axis=1, keepdims=True)
    rstd_ref[...] += jnp.sum(x * x, axis=1, keepdims=True)

    @pl.when(s == pl.num_programs(1) - 1)
    def _():
        m = mean_ref[...] * inv_count
        var = jnp.maximum(rstd_ref[...] * inv_count - m * m, 0.0)
        mean_ref[...] = m
        rstd_ref[...] = jax.lax.rsqrt(var + IN_EPS)


def _instnorm_apply_kernel(x_ref, mean_ref, rstd_ref, o_ref):
    x = x_ref[...].astype(jnp.float32)                # (1, thw, C)
    y = (x - mean_ref[...]) * rstd_ref[...]
    o_ref[...] = jnp.where(y >= 0, y, NEG_SLOPE * y).astype(o_ref.dtype)


def instnorm_lrelu_pallas(x_nhwc):
    N, H, W, C = x_nhwc.shape
    HW = H * W
    if HW <= HW_TILE:
        thw = _round_up(HW, 8)
        HW_pad = thw
    else:
        thw = HW_TILE
        HW_pad = _round_up(HW, thw)
    nhw = HW_pad // thw

    x = x_nhwc.reshape(N, HW, C)
    if HW_pad != HW:
        x = jnp.pad(x, ((0, 0), (0, HW_pad - HW), (0, 0)))   # zeros: inert in sums

    inv_count = 1.0 / HW                      # statistics over real pixels only

    # Pass 1: per-(sample, channel) mean and rsqrt(var + eps).
    mean, rstd = pl.pallas_call(
        functools.partial(_instnorm_stats_kernel, inv_count=inv_count),
        out_shape=(jax.ShapeDtypeStruct((N, 1, C), jnp.float32),
                   jax.ShapeDtypeStruct((N, 1, C), jnp.float32)),
        grid=(N, nhw),
        in_specs=[pl.BlockSpec((1, thw, C), lambda n, s: (n, s, 0))],
        out_specs=(pl.BlockSpec((1, 1, C), lambda n, s: (n, 0, 0)),
                   pl.BlockSpec((1, 1, C), lambda n, s: (n, 0, 0))),
        compiler_params=pltpu.CompilerParams(
            dimension_semantics=("parallel", "arbitrary"),
            vmem_limit_bytes=VMEM_LIMIT),
        cost_estimate=pl.CostEstimate(
            flops=3 * N * HW_pad * C, transcendentals=N * C,
            bytes_accessed=2 * N * HW_pad * C + 8 * N * C),
    )(x)

    # Pass 2: normalize + LeakyReLU (fully parallel over (n, hw-tile)).
    y = pl.pallas_call(
        _instnorm_apply_kernel,
        out_shape=jax.ShapeDtypeStruct((N, HW_pad, C), jnp.bfloat16),
        grid=(N, nhw),
        in_specs=[pl.BlockSpec((1, thw, C), lambda n, s: (n, s, 0)),
                  pl.BlockSpec((1, 1, C), lambda n, s: (n, 0, 0)),
                  pl.BlockSpec((1, 1, C), lambda n, s: (n, 0, 0))],
        out_specs=pl.BlockSpec((1, thw, C), lambda n, s: (n, s, 0)),
        compiler_params=pltpu.CompilerParams(
            dimension_semantics=("parallel", "parallel"),
            vmem_limit_bytes=VMEM_LIMIT),
        cost_estimate=pl.CostEstimate(
            flops=4 * N * HW_pad * C, transcendentals=0,
            bytes_accessed=4 * N * HW_pad * C + 8 * N * C),
    )(x, mean, rstd)

    return y[:, :HW].reshape(N, H, W, C)


# ---------------------------------------------------------------------------
# Parameter construction (mirrors __init__ shapes; weights ~ N(0, 0.02),
# bias only where the PyTorch module has it: first and last conv; the
# conv_norm_lrelu blocks use bias=False).
# ---------------------------------------------------------------------------
def init_params(key, n_layers, dim):
    def normal(k, shape):
        return 0.02 * jax.random.normal(k, shape, dtype=jnp.float32)

    keys = jax.random.split(key, n_layers + 2)
    layers = []

    # Conv2d(3, dim, 4, 2, 1) + LeakyReLU(0.2): bias=True, lrelu fused.
    layers.append(dict(w=normal(keys[0], (dim, 3, 4, 4)),
                       b=jnp.zeros((dim,), jnp.float32),
                       stride=2, norm=False, lrelu=True))

    nf_mult = 1
    for n in range(1, n_layers):
        nf_mult_prev = nf_mult
        nf_mult = min(2 ** n, 8)
        layers.append(dict(
            w=normal(keys[n], (dim * nf_mult, dim * nf_mult_prev, 4, 4)),
            b=None,                                   # bias=False in conv_norm_lrelu
            stride=2, norm=True, lrelu=False))

    nf_mult_prev = nf_mult
    nf_mult = min(2 ** n_layers, 8)
    layers.append(dict(
        w=normal(keys[n_layers], (dim * nf_mult, dim * nf_mult_prev, 4, 4)),
        b=None,                                       # bias=False in conv_norm_lrelu
        stride=1, norm=True, lrelu=False))

    # Final Conv2d(dim*nf_mult, 1, 4, 1, 1): bias=True, no norm/relu.
    layers.append(dict(w=normal(keys[n_layers + 1], (1, dim * nf_mult, 4, 4)),
                       b=jnp.zeros((1,), jnp.float32),
                       stride=1, norm=False, lrelu=False))
    return layers


def nlayer_discriminator_forward(x_nchw, layers):
    x = jnp.transpose(x_nchw, (0, 2, 3, 1)).astype(jnp.bfloat16)  # NCHW -> NHWC bf16
    for li, layer in enumerate(layers):
        last = li == len(layers) - 1
        x = conv2d_pallas(x, layer["w"], layer["b"],
                          stride=layer["stride"], padding=1,
                          apply_lrelu=layer["lrelu"],
                          out_dtype=jnp.float32 if last else jnp.bfloat16)
        if layer["norm"]:
            x = instnorm_lrelu_pallas(x)
    cout_final = layers[-1]["w"].shape[0]             # drop lane-padding channels
    x = x[..., :cout_final].astype(jnp.float32)
    return jnp.transpose(x, (0, 3, 1, 2))             # back to NCHW


if __name__ == "__main__":
    key = jax.random.PRNGKey(0)
    kx, kp = jax.random.split(key)

    n_layers, dim = 2, 8                              # small synthetic config
    x = jax.random.normal(kx, (2, 3, 16, 16), dtype=jnp.float32)  # NCHW input

    params = init_params(kp, n_layers, dim)
    fwd = jax.jit(lambda inp: nlayer_discriminator_forward(inp, params))
    y = fwd(x)
    jax.block_until_ready(y)

    # 16 ->(s2) 8 ->(s2) 4 ->(s1) 3 ->(s1) 2 ; final channel = 1
    assert y.shape == (2, 1, 2, 2), y.shape
    assert y.dtype == jnp.float32
    print("KERNEL_OK")
</pallas_src>

<mosaic_0001>
module attributes {stable_mosaic.version = 11 : i64} {
  func.func @_matmul_bias_act_kernel(%arg0: i32, %arg1: i32, %arg2: i32, %arg3: memref<128x128xbf16, #tpu.memory_space<vmem>>, %arg4: memref<128x128xbf16, #tpu.memory_space<vmem>>, %arg5: memref<1x128xf32, #tpu.memory_space<vmem>>, %arg6: memref<128x128xbf16, #tpu.memory_space<vmem>>, %arg7: memref<128x128xf32, #tpu.memory_space<vmem>>) attributes {dimension_semantics = [#tpu.dimension_semantics<parallel>, #tpu.dimension_semantics<parallel>, #tpu.dimension_semantics<arbitrary>], iteration_bounds = array<i64: 1, 1, 1>, scalar_prefetch = 0 : i64, scratch_operands = 1 : i64, tpu.core_type = #tpu.core_type<tc>, window_params = [{transform_indices = @transform_0, window_bounds = array<i64: 128, 128>}, {transform_indices = @transform_1, window_bounds = array<i64: 128, 128>}, {transform_indices = @transform_2, window_bounds = array<i64: 1, 128>}, {transform_indices = @transform_3, window_bounds = array<i64: 128, 128>}]} {
    %c0_i32 = arith.constant 0 : i32
    %0 = arith.cmpi eq, %arg2, %c0_i32 : i32
    %1 = arith.extui %0 : i1 to i32
    %c0_i32_0 = arith.constant 0 : i32
    %2 = arith.cmpi ne, %1, %c0_i32_0 : i32
    scf.if %2 {
      %cst_10 = arith.constant 0.000000e+00 : f32
      %12 = vector.broadcast %cst_10 : f32 to vector<128x128xf32>
      %c0_11 = arith.constant 0 : index
      %c0_12 = arith.constant 0 : index
      %13 = vector.load %arg7[%c0_11, %c0_12] : memref<128x128xf32, #tpu.memory_space<vmem>>, vector<128x128xf32>
      tpu.vector_store %arg7[%c0_11, %c0_12], %12 {strides = array<i32>} : memref<128x128xf32, #tpu.memory_space<vmem>>, vector<128x128xf32>,
    } else {
    }
    %c0 = arith.constant 0 : index
    %c0_1 = arith.constant 0 : index
    %3 = vector.load %arg7[%c0, %c0_1] : memref<128x128xf32, #tpu.memory_space<vmem>>, vector<128x128xf32>
    %c0_2 = arith.constant 0 : index
    %c0_3 = arith.constant 0 : index
    %4 = vector.load %arg3[%c0_2, %c0_3] : memref<128x128xbf16, #tpu.memory_space<vmem>>, vector<128x128xbf16>
    %c0_4 = arith.constant 0 : index
    %c0_5 = arith.constant 0 : index
    %5 = vector.load %arg4[%c0_4, %c0_5] : memref<128x128xbf16, #tpu.memory_space<vmem>>, vector<128x128xbf16>
    %cst = arith.constant dense<0.000000e+00> : vector<128x128xf32>
    %6 = tpu.matmul %4, %5, %cst {dimension_numbers = #tpu.dot_dimension_numbers<[1], [0], [0], [1], [0, 0, 1, 1], [], []>} : vector<128x128xbf16>, vector<128x128xbf16>, vector<128x128xf32> -> vector<128x128xf32>
    %7 = arith.addf %3, %6 : vector<128x128xf32>
    %c0_6 = arith.constant 0 : index
    %c0_7 = arith.constant 0 : index
    %8 = vector.load %arg7[%c0_6, %c0_7] : memref<128x128xf32, #tpu.memory_space<vmem>>, vector<128x128xf32>
    tpu.vector_store %arg7[%c0_6, %c0_7], %7 {strides = array<i32>} : memref<128x128xf32, #tpu.memory_space<vmem>>, vector<128x128xf32>,
    %c0_i32_8 = arith.constant 0 : i32
    %9 = arith.cmpi eq, %arg2, %c0_i32_8 : i32
    %10 = arith.extui %9 : i1 to i32
    %c0_i32_9 = arith.constant 0 : i32
    %11 = arith.cmpi ne, %10, %c0_i32_9 : i32
    scf.if %11 {
      %c0_10 = arith.constant 0 : index
      %c0_11 = arith.constant 0 : index
      %12 = vector.load %arg7[%c0_10, %c0_11] : memref<128x128xf32, #tpu.memory_space<vmem>>, vector<128x128xf32>
      %c0_12 = arith.constant 0 : index
      %c0_13 = arith.constant 0 : index
      %13 = vector.load %arg5[%c0_12, %c0_13] : memref<1x128xf32, #tpu.memory_space<vmem>>, vector<1x128xf32>
      %14 = vector.broadcast %13 : vector<1x128xf32> to vector<128x128xf32>
      %15 = arith.addf %12, %14 : vector<128x128xf32>
      %cst_14 = arith.constant 0.000000e+00 : f32
      %16 = vector.broadcast %cst_14 : f32 to vector<128x128xf32>
      %17 = arith.cmpf oge, %15, %16 : vector<128x128xf32>
      %cst_15 = arith.constant 2.000000e-01 : f32
      %18 = vector.broadcast %cst_15 : f32 to vector<128x128xf32>
      %19 = arith.mulf %18, %15 : vector<128x128xf32>
      %20 = arith.select %17, %15, %19 : vector<128x128xi1>, vector<128x128xf32>
      %21 = arith.truncf %20 : vector<128x128xf32> to vector<128x128xbf16>
      %c0_16 = arith.constant 0 : index
      %c0_17 = arith.constant 0 : index
      %22 = vector.load %arg6[%c0_16, %c0_17] : memref<128x128xbf16, #tpu.memory_space<vmem>>, vector<128x128xbf16>
      tpu.vector_store %arg6[%c0_16, %c0_17], %21 {strides = array<i32>} : memref<128x128xbf16, #tpu.memory_space<vmem>>, vector<128x128xbf16>,
    } else {
    }
    return
  }
  func.func @transform_0(%arg0: i32, %arg1: i32, %arg2: i32) -> (i32, i32) {
    %c0_i32 = arith.constant 0 : i32
    return %arg0, %arg2 : i32, i32
  }
  func.func @transform_1(%arg0: i32, %arg1: i32, %arg2: i32) -> (i32, i32) {
    %c0_i32 = arith.constant 0 : i32
    return %arg2, %arg1 : i32, i32
  }
  func.func @transform_2(%arg0: i32, %arg1: i32, %arg2: i32) -> (i32, i32) {
    %c0_i32 = arith.constant 0 : i32
    %c0_i32_0 = arith.constant 0 : i32
    return %c0_i32, %arg1 : i32, i32
  }
  func.func @transform_3(%arg0: i32, %arg1: i32, %arg2: i32) -> (i32, i32) {
    %c0_i32 = arith.constant 0 : i32
    return %arg0, %arg1 : i32, i32
  }
}

module attributes {stable_mosaic.version = 11 : i64} {
  func.func @_instnorm_apply_kernel(%arg0: i32, %arg1: i32, %arg2: memref<1x16x128xbf16, #tpu.memory_space<vmem>>, %arg3: memref<1x1x128xf32, #tpu.memory_space<vmem>>, %arg4: memref<1x1x128xf32, #tpu.memory_space<vmem>>, %arg5: memref<1x16x128xbf16, #tpu.memory_space<vmem>>) attributes {dimension_semantics = [#tpu.dimension_semantics<parallel>, #tpu.dimension_semantics<parallel>], iteration_bounds = array<i64: 2, 1>, scalar_prefetch = 0 : i64, scratch_operands = 0 : i64, tpu.core_type = #tpu.core_type<tc>, window_params = [{transform_indices = @transform_0, window_bounds = array<i64: 1, 16, 128>}, {transform_indices = @transform_1, window_bounds = array<i64: 1, 1, 128>}, {transform_indices = @transform_2, window_bounds = array<i64: 1, 1, 128>}, {transform_indices = @transform_3, window_bounds = array<i64: 1, 16, 128>}]} {
    %c0 = arith.constant 0 : index
    %c0_0 = arith.constant 0 : index
    %c0_1 = arith.constant 0 : index
    %0 = vector.load %arg2[%c0, %c0_0, %c0_1] : memref<1x16x128xbf16, #tpu.memory_space<vmem>>, vector<1x16x128xbf16>
    %1 = arith.extf %0 : vector<1x16x128xbf16> to vector<1x16x128xf32>
    %c0_2 = arith.constant 0 : index
    %c0_3 = arith.constant 0 : index
    %c0_4 = arith.constant 0 : index
    %2 = vector.load %arg3[%c0_2, %c0_3, %c0_4] : memref<1x1x128xf32, #tpu.memory_space<vmem>>, vector<1x1x128xf32>
    %3 = vector.broadcast %2 : vector<1x1x128xf32> to vector<1x16x128xf32>
    %4 = arith.subf %1, %3 : vector<1x16x128xf32>
    %c0_5 = arith.constant 0 : index
    %c0_6 = arith.constant 0 : index
    %c0_7 = arith.constant 0 : index
    %5 = vector.load %arg4[%c0_5, %c0_6, %c0_7] : memref<1x1x128xf32, #tpu.memory_space<vmem>>, vector<1x1x128xf32>
    %6 = vector.broadcast %5 : vector<1x1x128xf32> to vector<1x16x128xf32>
    %7 = arith.mulf %4, %6 : vector<1x16x128xf32>
    %cst = arith.constant 0.000000e+00 : f32
    %8 = vector.broadcast %cst : f32 to vector<1x16x128xf32>
    %9 = arith.cmpf oge, %7, %8 : vector<1x16x128xf32>
    %cst_8 = arith.constant 2.000000e-01 : f32
    %10 = vector.broadcast %cst_8 : f32 to vector<1x16x128xf32>
    %11 = arith.mulf %10, %7 : vector<1x16x128xf32>
    %12 = arith.select %9, %7, %11 : vector<1x16x128xi1>, vector<1x16x128xf32>
    %13 = arith.truncf %12 : vector<1x16x128xf32> to vector<1x16x128xbf16>
    %c0_9 = arith.constant 0 : index
    %c0_10 = arith.constant 0 : index
    %c0_11 = arith.constant 0 : index
    %14 = vector.load %arg5[%c0_9, %c0_10, %c0_11] : memref<1x16x128xbf16, #tpu.memory_space<vmem>>, vector<1x16x128xbf16>
    tpu.vector_store %arg5[%c0_9, %c0_10, %c0_11], %13 {strides = array<i32>} : memref<1x16x128xbf16, #tpu.memory_space<vmem>>, vector<1x16x128xbf16>,
    return
  }
  func.func @transform_0(%arg0: i32, %arg1: i32) -> (i32, i32, i32) {
    %c0_i32 = arith.constant 0 : i32
    %c0_i32_0 = arith.constant 0 : i32
    return %arg0, %arg1, %c0_i32 : i32, i32, i32
  }
  func.func @transform_1(%arg0: i32, %arg1: i32) -> (i32, i32, i32) {
    %c0_i32 = arith.constant 0 : i32
    %c0_i32_0 = arith.constant 0 : i32
    %c0_i32_1 = arith.constant 0 : i32
    return %arg0, %c0_i32, %c0_i32_0 : i32, i32, i32
  }
  func.func @transform_2(%arg0: i32, %arg1: i32) -> (i32, i32, i32) {
    %c0_i32 = arith.constant 0 : i32
    %c0_i32_0 = arith.constant 0 : i32
    %c0_i32_1 = arith.constant 0 : i32
    return %arg0, %c0_i32, %c0_i32_0 : i32, i32, i32
  }
  func.func @transform_3(%arg0: i32, %arg1: i32) -> (i32, i32, i32) {
    %c0_i32 = arith.constant 0 : i32
    %c0_i32_0 = arith.constant 0 : i32
    return %arg0, %arg1, %c0_i32 : i32, i32, i32
  }
}

module attributes {stable_mosaic.version = 11 : i64} {
  func.func @_matmul_bias_act_kernel(%arg0: i32, %arg1: i32, %arg2: i32, %arg3: memref<32x512xbf16, #tpu.memory_space<vmem>>, %arg4: memref<512x128xbf16, #tpu.memory_space<vmem>>, %arg5: memref<1x128xf32, #tpu.memory_space<vmem>>, %arg6: memref<32x128xbf16, #tpu.memory_space<vmem>>, %arg7: memref<32x128xf32, #tpu.memory_space<vmem>>) attributes {dimension_semantics = [#tpu.dimension_semantics<parallel>, #tpu.dimension_semantics<parallel>, #tpu.dimension_semantics<arbitrary>], iteration_bounds = array<i64: 1, 1, 4>, scalar_prefetch = 0 : i64, scratch_operands = 1 : i64, tpu.core_type = #tpu.core_type<tc>, window_params = [{transform_indices = @transform_0, window_bounds = array<i64: 32, 512>}, {transform_indices = @transform_1, window_bounds = array<i64: 512, 128>}, {transform_indices = @transform_2, window_bounds = array<i64: 1, 128>}, {transform_indices = @transform_3, window_bounds = array<i64: 32, 128>}]} {
    %c0_i32 = arith.constant 0 : i32
    %0 = arith.cmpi eq, %arg2, %c0_i32 : i32
    %1 = arith.extui %0 : i1 to i32
    %c0_i32_0 = arith.constant 0 : i32
    %2 = arith.cmpi ne, %1, %c0_i32_0 : i32
    scf.if %2 {
      %cst_9 = arith.constant 0.000000e+00 : f32
      %12 = vector.broadcast %cst_9 : f32 to vector<32x128xf32>
      %c0_10 = arith.constant 0 : index
      %c0_11 = arith.constant 0 : index
      %13 = vector.load %arg7[%c0_10, %c0_11] : memref<32x128xf32, #tpu.memory_space<vmem>>, vector<32x128xf32>
      tpu.vector_store %arg7[%c0_10, %c0_11], %12 {strides = array<i32>} : memref<32x128xf32, #tpu.memory_space<vmem>>, vector<32x128xf32>,
    } else {
    }
    %c0 = arith.constant 0 : index
    %c0_1 = arith.constant 0 : index
    %3 = vector.load %arg7[%c0, %c0_1] : memref<32x128xf32, #tpu.memory_space<vmem>>, vector<32x128xf32>
    %c0_2 = arith.constant 0 : index
    %c0_3 = arith.constant 0 : index
    %4 = vector.load %arg3[%c0_2, %c0_3] : memref<32x512xbf16, #tpu.memory_space<vmem>>, vector<32x512xbf16>
    %c0_4 = arith.constant 0 : index
    %c0_5 = arith.constant 0 : index
    %5 = vector.load %arg4[%c0_4, %c0_5] : memref<512x128xbf16, #tpu.memory_space<vmem>>, vector<512x128xbf16>
    %cst = arith.constant dense<0.000000e+00> : vector<32x128xf32>
    %6 = tpu.matmul %4, %5, %cst {dimension_numbers = #tpu.dot_dimension_numbers<[1], [0], [0], [1], [0, 0, 1, 1], [], []>} : vector<32x512xbf16>, vector<512x128xbf16>, vector<32x128xf32> -> vector<32x128xf32>
    %7 = arith.addf %3, %6 : vector<32x128xf32>
    %c0_6 = arith.constant 0 : index
    %c0_7 = arith.constant 0 : index
    %8 = vector.load %arg7[%c0_6, %c0_7] : memref<32x128xf32, #tpu.memory_space<vmem>>, vector<32x128xf32>
    tpu.vector_store %arg7[%c0_6, %c0_7], %7 {strides = array<i32>} : memref<32x128xf32, #tpu.memory_space<vmem>>, vector<32x128xf32>,
    %c3_i32 = arith.constant 3 : i32
    %9 = arith.cmpi eq, %arg2, %c3_i32 : i32
    %10 = arith.extui %9 : i1 to i32
    %c0_i32_8 = arith.constant 0 : i32
    %11 = arith.cmpi ne, %10, %c0_i32_8 : i32
    scf.if %11 {
      %c0_9 = arith.constant 0 : index
      %c0_10 = arith.constant 0 : index
      %12 = vector.load %arg7[%c0_9, %c0_10] : memref<32x128xf32, #tpu.memory_space<vmem>>, vector<32x128xf32>
      %13 = arith.truncf %12 : vector<32x128xf32> to vector<32x128xbf16>
      %c0_11 = arith.constant 0 : index
      %c0_12 = arith.constant 0 : index
      %14 = vector.load %arg6[%c0_11, %c0_12] : memref<32x128xbf16, #tpu.memory_space<vmem>>, vector<32x128xbf16>
      tpu.vector_store %arg6[%c0_11, %c0_12], %13 {strides = array<i32>} : memref<32x128xbf16, #tpu.memory_space<vmem>>, vector<32x128xbf16>,
    } else {
    }
    return
  }
  func.func @transform_0(%arg0: i32, %arg1: i32, %arg2: i32) -> (i32, i32) {
    %c0_i32 = arith.constant 0 : i32
    return %arg0, %arg2 : i32, i32
  }
  func.func @transform_1(%arg0: i32, %arg1: i32, %arg2: i32) -> (i32, i32) {
    %c0_i32 = arith.constant 0 : i32
    return %arg2, %arg1 : i32, i32
  }
  func.func @transform_2(%arg0: i32, %arg1: i32, %arg2: i32) -> (i32, i32) {
    %c0_i32 = arith.constant 0 : i32
    %c0_i32_0 = arith.constant 0 : i32
    return %c0_i32, %arg1 : i32, i32
  }
  func.func @transform_3(%arg0: i32, %arg1: i32, %arg2: i32) -> (i32, i32) {
    %c0_i32 = arith.constant 0 : i32
    return %arg0, %arg1 : i32, i32
  }
}

module attributes {stable_mosaic.version = 11 : i64} {
  func.func @_instnorm_stats_kernel(%arg0: i32, %arg1: i32, %arg2: memref<1x16x128xbf16, #tpu.memory_space<vmem>>, %arg3: memref<1x1x128xf32, #tpu.memory_space<vmem>>, %arg4: memref<1x1x128xf32, #tpu.memory_space<vmem>>) attributes {dimension_semantics = [#tpu.dimension_semantics<parallel>, #tpu.dimension_semantics<arbitrary>], iteration_bounds = array<i64: 2, 1>, scalar_prefetch = 0 : i64, scratch_operands = 0 : i64, tpu.core_type = #tpu.core_type<tc>, window_params = [{transform_indices = @transform_0, window_bounds = array<i64: 1, 16, 128>}, {transform_indices = @transform_1, window_bounds = array<i64: 1, 1, 128>}, {transform_indices = @transform_2, window_bounds = array<i64: 1, 1, 128>}]} {
    %c0_i32 = arith.constant 0 : i32
    %0 = arith.cmpi eq, %arg1, %c0_i32 : i32
    %1 = arith.extui %0 : i1 to i32
    %c0_i32_0 = arith.constant 0 : i32
    %2 = arith.cmpi ne, %1, %c0_i32_0 : i32
    scf.if %2 {
      %cst_18 = arith.constant 0.000000e+00 : f32
      %19 = vector.broadcast %cst_18 : f32 to vector<1x1x128xf32>
      %c0_19 = arith.constant 0 : index
      %c0_20 = arith.constant 0 : index
      %c0_21 = arith.constant 0 : index
      %20 = vector.load %arg3[%c0_19, %c0_20, %c0_21] : memref<1x1x128xf32, #tpu.memory_space<vmem>>, vector<1x1x128xf32>
      tpu.vector_store %arg3[%c0_19, %c0_20, %c0_21], %19 {strides = array<i32>} : memref<1x1x128xf32, #tpu.memory_space<vmem>>, vector<1x1x128xf32>,
      %cst_22 = arith.constant 0.000000e+00 : f32
      %21 = vector.broadcast %cst_22 : f32 to vector<1x1x128xf32>
      %c0_23 = arith.constant 0 : index
      %c0_24 = arith.constant 0 : index
      %c0_25 = arith.constant 0 : index
      %22 = vector.load %arg4[%c0_23, %c0_24, %c0_25] : memref<1x1x128xf32, #tpu.memory_space<vmem>>, vector<1x1x128xf32>
      tpu.vector_store %arg4[%c0_23, %c0_24, %c0_25], %21 {strides = array<i32>} : memref<1x1x128xf32, #tpu.memory_space<vmem>>, vector<1x1x128xf32>,
    } else {
    }
    %c0 = arith.constant 0 : index
    %c0_1 = arith.constant 0 : index
    %c0_2 = arith.constant 0 : index
    %3 = vector.load %arg2[%c0, %c0_1, %c0_2] : memref<1x16x128xbf16, #tpu.memory_space<vmem>>, vector<1x16x128xbf16>
    %4 = arith.extf %3 : vector<1x16x128xbf16> to vector<1x16x128xf32>
    %c0_3 = arith.constant 0 : index
    %c0_4 = arith.constant 0 : index
    %c0_5 = arith.constant 0 : index
    %5 = vector.load %arg3[%c0_3, %c0_4, %c0_5] : memref<1x1x128xf32, #tpu.memory_space<vmem>>, vector<1x1x128xf32>
    %cst = arith.constant dense<0.000000e+00> : vector<1x128xf32>
    %6 = vector.multi_reduction <add>, %4, %cst [1] : vector<1x16x128xf32> to vector<1x128xf32>
    %7 = vector.shape_cast %6 : vector<1x128xf32> to vector<1x1x128xf32>
    %8 = arith.addf %5, %7 : vector<1x1x128xf32>
    %c0_6 = arith.constant 0 : index
    %c0_7 = arith.constant 0 : index
    %c0_8 = arith.constant 0 : index
    %9 = vector.load %arg3[%c0_6, %c0_7, %c0_8] : memref<1x1x128xf32, #tpu.memory_space<vmem>>, vector<1x1x128xf32>
    tpu.vector_store %arg3[%c0_6, %c0_7, %c0_8], %8 {strides = array<i32>} : memref<1x1x128xf32, #tpu.memory_space<vmem>>, vector<1x1x128xf32>,
    %c0_9 = arith.constant 0 : index
    %c0_10 = arith.constant 0 : index
    %c0_11 = arith.constant 0 : index
    %10 = vector.load %arg4[%c0_9, %c0_10, %c0_11] : memref<1x1x128xf32, #tpu.memory_space<vmem>>, vector<1x1x128xf32>
    %11 = arith.mulf %4, %4 : vector<1x16x128xf32>
    %cst_12 = arith.constant dense<0.000000e+00> : vector<1x128xf32>
    %12 = vector.multi_reduction <add>, %11, %cst_12 [1] : vector<1x16x128xf32> to vector<1x128xf32>
    %13 = vector.shape_cast %12 : vector<1x128xf32> to vector<1x1x128xf32>
    %14 = arith.addf %10, %13 : vector<1x1x128xf32>
    %c0_13 = arith.constant 0 : index
    %c0_14 = arith.constant 0 : index
    %c0_15 = arith.constant 0 : index
    %15 = vector.load %arg4[%c0_13, %c0_14, %c0_15] : memref<1x1x128xf32, #tpu.memory_space<vmem>>, vector<1x1x128xf32>
    tpu.vector_store %arg4[%c0_13, %c0_14, %c0_15], %14 {strides = array<i32>} : memref<1x1x128xf32, #tpu.memory_space<vmem>>, vector<1x1x128xf32>,
    %c0_i32_16 = arith.constant 0 : i32
    %16 = arith.cmpi eq, %arg1, %c0_i32_16 : i32
    %17 = arith.extui %16 : i1 to i32
    %c0_i32_17 = arith.constant 0 : i32
    %18 = arith.cmpi ne, %17, %c0_i32_17 : i32
    scf.if %18 {
      %c0_18 = arith.constant 0 : index
      %c0_19 = arith.constant 0 : index
      %c0_20 = arith.constant 0 : index
      %19 = vector.load %arg3[%c0_18, %c0_19, %c0_20] : memref<1x1x128xf32, #tpu.memory_space<vmem>>, vector<1x1x128xf32>
      %cst_21 = arith.constant 6.250000e-02 : f32
      %20 = vector.broadcast %cst_21 : f32 to vector<1x1x128xf32>
      %21 = arith.mulf %19, %20 : vector<1x1x128xf32>
      %c0_22 = arith.constant 0 : index
      %c0_23 = arith.constant 0 : index
      %c0_24 = arith.constant 0 : index
      %22 = vector.load %arg4[%c0_22, %c0_23, %c0_24] : memref<1x1x128xf32, #tpu.memory_space<vmem>>, vector<1x1x128xf32>
      %cst_25 = arith.constant 6.250000e-02 : f32
      %23 = vector.broadcast %cst_25 : f32 to vector<1x1x128xf32>
      %24 = arith.mulf %22, %23 : vector<1x1x128xf32>
      %25 = arith.mulf %21, %21 : vector<1x1x128xf32>
      %26 = arith.subf %24, %25 : vector<1x1x128xf32>
      %cst_26 = arith.constant 0.000000e+00 : f32
      %27 = vector.broadcast %cst_26 : f32 to vector<1x1x128xf32>
      %28 = arith.maximumf %26, %27 : vector<1x1x128xf32>
      %c0_27 = arith.constant 0 : index
      %c0_28 = arith.constant 0 : index
      %c0_29 = arith.constant 0 : index
      %29 = vector.load %arg3[%c0_27, %c0_28, %c0_29] : memref<1x1x128xf32, #tpu.memory_space<vmem>>, vector<1x1x128xf32>
      tpu.vector_store %arg3[%c0_27, %c0_28, %c0_29], %21 {strides = array<i32>} : memref<1x1x128xf32, #tpu.memory_space<vmem>>, vector<1x1x128xf32>,
      %cst_30 = arith.constant 9.99999974E-6 : f32
      %30 = vector.broadcast %cst_30 : f32 to vector<1x1x128xf32>
      %31 = arith.addf %28, %30 : vector<1x1x128xf32>
      %32 = math.rsqrt %31 : vector<1x1x128xf32>
      %c0_31 = arith.constant 0 : index
      %c0_32 = arith.constant 0 : index
      %c0_33 = arith.constant 0 : index
      %33 = vector.load %arg4[%c0_31, %c0_32, %c0_33] : memref<1x1x128xf32, #tpu.memory_space<vmem>>, vector<1x1x128xf32>
      tpu.vector_store %arg4[%c0_31, %c0_32, %c0_33], %32 {strides = array<i32>} : memref<1x1x128xf32, #tpu.memory_space<vmem>>, vector<1x1x128xf32>,
    } else {
    }
    return
  }
  func.func @transform_0(%arg0: i32, %arg1: i32) -> (i32, i32, i32) {
    %c0_i32 = arith.constant 0 : i32
    %c0_i32_0 = arith.constant 0 : i32
    return %arg0, %arg1, %c0_i32 : i32, i32, i32
  }
  func.func @transform_1(%arg0: i32, %arg1: i32) -> (i32, i32, i32) {
    %c0_i32 = arith.constant 0 : i32
    %c0_i32_0 = arith.constant 0 : i32
    %c0_i32_1 = arith.constant 0 : i32
    return %arg0, %c0_i32, %c0_i32_0 : i32, i32, i32
  }
  func.func @transform_2(%arg0: i32, %arg1: i32) -> (i32, i32, i32) {
    %c0_i32 = arith.constant 0 : i32
    %c0_i32_0 = arith.constant 0 : i32
    %c0_i32_1 = arith.constant 0 : i32
    return %arg0, %c0_i32, %c0_i32_0 : i32, i32, i32
  }
}

module attributes {stable_mosaic.version = 11 : i64} {
  func.func @_instnorm_stats_kernel(%arg0: i32, %arg1: i32, %arg2: memref<1x16x128xbf16, #tpu.memory_space<vmem>>, %arg3: memref<1x1x128xf32, #tpu.memory_space<vmem>>, %arg4: memref<1x1x128xf32, #tpu.memory_space<vmem>>) attributes {dimension_semantics = [#tpu.dimension_semantics<parallel>, #tpu.dimension_semantics<arbitrary>], iteration_bounds = array<i64: 2, 1>, scalar_prefetch = 0 : i64, scratch_operands = 0 : i64, tpu.core_type = #tpu.core_type<tc>, window_params = [{transform_indices = @transform_0, window_bounds = array<i64: 1, 16, 128>}, {transform_indices = @transform_1, window_bounds = array<i64: 1, 1, 128>}, {transform_indices = @transform_2, window_bounds = array<i64: 1, 1, 128>}]} {
    %c0_i32 = arith.constant 0 : i32
    %0 = arith.cmpi eq, %arg1, %c0_i32 : i32
    %1 = arith.extui %0 : i1 to i32
    %c0_i32_0 = arith.constant 0 : i32
    %2 = arith.cmpi ne, %1, %c0_i32_0 : i32
    scf.if %2 {
      %cst_18 = arith.constant 0.000000e+00 : f32
      %19 = vector.broadcast %cst_18 : f32 to vector<1x1x128xf32>
      %c0_19 = arith.constant 0 : index
      %c0_20 = arith.constant 0 : index
      %c0_21 = arith.constant 0 : index
      %20 = vector.load %arg3[%c0_19, %c0_20, %c0_21] : memref<1x1x128xf32, #tpu.memory_space<vmem>>, vector<1x1x128xf32>
      tpu.vector_store %arg3[%c0_19, %c0_20, %c0_21], %19 {strides = array<i32>} : memref<1x1x128xf32, #tpu.memory_space<vmem>>, vector<1x1x128xf32>,
      %cst_22 = arith.constant 0.000000e+00 : f32
      %21 = vector.broadcast %cst_22 : f32 to vector<1x1x128xf32>
      %c0_23 = arith.constant 0 : index
      %c0_24 = arith.constant 0 : index
      %c0_25 = arith.constant 0 : index
      %22 = vector.load %arg4[%c0_23, %c0_24, %c0_25] : memref<1x1x128xf32, #tpu.memory_space<vmem>>, vector<1x1x128xf32>
      tpu.vector_store %arg4[%c0_23, %c0_24, %c0_25], %21 {strides = array<i32>} : memref<1x1x128xf32, #tpu.memory_space<vmem>>, vector<1x1x128xf32>,
    } else {
    }
    %c0 = arith.constant 0 : index
    %c0_1 = arith.constant 0 : index
    %c0_2 = arith.constant 0 : index
    %3 = vector.load %arg2[%c0, %c0_1, %c0_2] : memref<1x16x128xbf16, #tpu.memory_space<vmem>>, vector<1x16x128xbf16>
    %4 = arith.extf %3 : vector<1x16x128xbf16> to vector<1x16x128xf32>
    %c0_3 = arith.constant 0 : index
    %c0_4 = arith.constant 0 : index
    %c0_5 = arith.constant 0 : index
    %5 = vector.load %arg3[%c0_3, %c0_4, %c0_5] : memref<1x1x128xf32, #tpu.memory_space<vmem>>, vector<1x1x128xf32>
    %cst = arith.constant dense<0.000000e+00> : vector<1x128xf32>
    %6 = vector.multi_reduction <add>, %4, %cst [1] : vector<1x16x128xf32> to vector<1x128xf32>
    %7 = vector.shape_cast %6 : vector<1x128xf32> to vector<1x1x128xf32>
    %8 = arith.addf %5, %7 : vector<1x1x128xf32>
    %c0_6 = arith.constant 0 : index
    %c0_7 = arith.constant 0 : index
    %c0_8 = arith.constant 0 : index
    %9 = vector.load %arg3[%c0_6, %c0_7, %c0_8] : memref<1x1x128xf32, #tpu.memory_space<vmem>>, vector<1x1x128xf32>
    tpu.vector_store %arg3[%c0_6, %c0_7, %c0_8], %8 {strides = array<i32>} : memref<1x1x128xf32, #tpu.memory_space<vmem>>, vector<1x1x128xf32>,
    %c0_9 = arith.constant 0 : index
    %c0_10 = arith.constant 0 : index
    %c0_11 = arith.constant 0 : index
    %10 = vector.load %arg4[%c0_9, %c0_10, %c0_11] : memref<1x1x128xf32, #tpu.memory_space<vmem>>, vector<1x1x128xf32>
    %11 = arith.mulf %4, %4 : vector<1x16x128xf32>
    %cst_12 = arith.constant dense<0.000000e+00> : vector<1x128xf32>
    %12 = vector.multi_reduction <add>, %11, %cst_12 [1] : vector<1x16x128xf32> to vector<1x128xf32>
    %13 = vector.shape_cast %12 : vector<1x128xf32> to vector<1x1x128xf32>
    %14 = arith.addf %10, %13 : vector<1x1x128xf32>
    %c0_13 = arith.constant 0 : index
    %c0_14 = arith.constant 0 : index
    %c0_15 = arith.constant 0 : index
    %15 = vector.load %arg4[%c0_13, %c0_14, %c0_15] : memref<1x1x128xf32, #tpu.memory_space<vmem>>, vector<1x1x128xf32>
    tpu.vector_store %arg4[%c0_13, %c0_14, %c0_15], %14 {strides = array<i32>} : memref<1x1x128xf32, #tpu.memory_space<vmem>>, vector<1x1x128xf32>,
    %c0_i32_16 = arith.constant 0 : i32
    %16 = arith.cmpi eq, %arg1, %c0_i32_16 : i32
    %17 = arith.extui %16 : i1 to i32
    %c0_i32_17 = arith.constant 0 : i32
    %18 = arith.cmpi ne, %17, %c0_i32_17 : i32
    scf.if %18 {
      %c0_18 = arith.constant 0 : index
      %c0_19 = arith.constant 0 : index
      %c0_20 = arith.constant 0 : index
      %19 = vector.load %arg3[%c0_18, %c0_19, %c0_20] : memref<1x1x128xf32, #tpu.memory_space<vmem>>, vector<1x1x128xf32>
      %cst_21 = arith.constant 0.111111112 : f32
      %20 = vector.broadcast %cst_21 : f32 to vector<1x1x128xf32>
      %21 = arith.mulf %19, %20 : vector<1x1x128xf32>
      %c0_22 = arith.constant 0 : index
      %c0_23 = arith.constant 0 : index
      %c0_24 = arith.constant 0 : index
      %22 = vector.load %arg4[%c0_22, %c0_23, %c0_24] : memref<1x1x128xf32, #tpu.memory_space<vmem>>, vector<1x1x128xf32>
      %cst_25 = arith.constant 0.111111112 : f32
      %23 = vector.broadcast %cst_25 : f32 to vector<1x1x128xf32>
      %24 = arith.mulf %22, %23 : vector<1x1x128xf32>
      %25 = arith.mulf %21, %21 : vector<1x1x128xf32>
      %26 = arith.subf %24, %25 : vector<1x1x128xf32>
      %cst_26 = arith.constant 0.000000e+00 : f32
      %27 = vector.broadcast %cst_26 : f32 to vector<1x1x128xf32>
      %28 = arith.maximumf %26, %27 : vector<1x1x128xf32>
      %c0_27 = arith.constant 0 : index
      %c0_28 = arith.constant 0 : index
      %c0_29 = arith.constant 0 : index
      %29 = vector.load %arg3[%c0_27, %c0_28, %c0_29] : memref<1x1x128xf32, #tpu.memory_space<vmem>>, vector<1x1x128xf32>
      tpu.vector_store %arg3[%c0_27, %c0_28, %c0_29], %21 {strides = array<i32>} : memref<1x1x128xf32, #tpu.memory_space<vmem>>, vector<1x1x128xf32>,
      %cst_30 = arith.constant 9.99999974E-6 : f32
      %30 = vector.broadcast %cst_30 : f32 to vector<1x1x128xf32>
      %31 = arith.addf %28, %30 : vector<1x1x128xf32>
      %32 = math.rsqrt %31 : vector<1x1x128xf32>
      %c0_31 = arith.constant 0 : index
      %c0_32 = arith.constant 0 : index
      %c0_33 = arith.constant 0 : index
      %33 = vector.load %arg4[%c0_31, %c0_32, %c0_33] : memref<1x1x128xf32, #tpu.memory_space<vmem>>, vector<1x1x128xf32>
      tpu.vector_store %arg4[%c0_31, %c0_32, %c0_33], %32 {strides = array<i32>} : memref<1x1x128xf32, #tpu.memory_space<vmem>>, vector<1x1x128xf32>,
    } else {
    }
    return
  }
  func.func @transform_0(%arg0: i32, %arg1: i32) -> (i32, i32, i32) {
    %c0_i32 = arith.constant 0 : i32
    %c0_i32_0 = arith.constant 0 : i32
    return %arg0, %arg1, %c0_i32 : i32, i32, i32
  }
  func.func @transform_1(%arg0: i32, %arg1: i32) -> (i32, i32, i32) {
    %c0_i32 = arith.constant 0 : i32
    %c0_i32_0 = arith.constant 0 : i32
    %c0_i32_1 = arith.constant 0 : i32
    return %arg0, %c0_i32, %c0_i32_0 : i32, i32, i32
  }
  func.func @transform_2(%arg0: i32, %arg1: i32) -> (i32, i32, i32) {
    %c0_i32 = arith.constant 0 : i32
    %c0_i32_0 = arith.constant 0 : i32
    %c0_i32_1 = arith.constant 0 : i32
    return %arg0, %c0_i32, %c0_i32_0 : i32, i32, i32
  }
}

module attributes {stable_mosaic.version = 11 : i64} {
  func.func @_matmul_bias_act_kernel(%arg0: i32, %arg1: i32, %arg2: i32, %arg3: memref<16x512xbf16, #tpu.memory_space<vmem>>, %arg4: memref<512x128xbf16, #tpu.memory_space<vmem>>, %arg5: memref<1x128xf32, #tpu.memory_space<vmem>>, %arg6: memref<16x128xf32, #tpu.memory_space<vmem>>, %arg7: memref<16x128xf32, #tpu.memory_space<vmem>>) attributes {dimension_semantics = [#tpu.dimension_semantics<parallel>, #tpu.dimension_semantics<parallel>, #tpu.dimension_semantics<arbitrary>], iteration_bounds = array<i64: 1, 1, 4>, scalar_prefetch = 0 : i64, scratch_operands = 1 : i64, tpu.core_type = #tpu.core_type<tc>, window_params = [{transform_indices = @transform_0, window_bounds = array<i64: 16, 512>}, {transform_indices = @transform_1, window_bounds = array<i64: 512, 128>}, {transform_indices = @transform_2, window_bounds = array<i64: 1, 128>}, {transform_indices = @transform_3, window_bounds = array<i64: 16, 128>}]} {
    %c0_i32 = arith.constant 0 : i32
    %0 = arith.cmpi eq, %arg2, %c0_i32 : i32
    %1 = arith.extui %0 : i1 to i32
    %c0_i32_0 = arith.constant 0 : i32
    %2 = arith.cmpi ne, %1, %c0_i32_0 : i32
    scf.if %2 {
      %cst_9 = arith.constant 0.000000e+00 : f32
      %12 = vector.broadcast %cst_9 : f32 to vector<16x128xf32>
      %c0_10 = arith.constant 0 : index
      %c0_11 = arith.constant 0 : index
      %13 = vector.load %arg7[%c0_10, %c0_11] : memref<16x128xf32, #tpu.memory_space<vmem>>, vector<16x128xf32>
      tpu.vector_store %arg7[%c0_10, %c0_11], %12 {strides = array<i32>} : memref<16x128xf32, #tpu.memory_space<vmem>>, vector<16x128xf32>,
    } else {
    }
    %c0 = arith.constant 0 : index
    %c0_1 = arith.constant 0 : index
    %3 = vector.load %arg7[%c0, %c0_1] : memref<16x128xf32, #tpu.memory_space<vmem>>, vector<16x128xf32>
    %c0_2 = arith.constant 0 : index
    %c0_3 = arith.constant 0 : index
    %4 = vector.load %arg3[%c0_2, %c0_3] : memref<16x512xbf16, #tpu.memory_space<vmem>>, vector<16x512xbf16>
    %c0_4 = arith.constant 0 : index
    %c0_5 = arith.constant 0 : index
    %5 = vector.load %arg4[%c0_4, %c0_5] : memref<512x128xbf16, #tpu.memory_space<vmem>>, vector<512x128xbf16>
    %cst = arith.constant dense<0.000000e+00> : vector<16x128xf32>
    %6 = tpu.matmul %4, %5, %cst {dimension_numbers = #tpu.dot_dimension_numbers<[1], [0], [0], [1], [0, 0, 1, 1], [], []>} : vector<16x512xbf16>, vector<512x128xbf16>, vector<16x128xf32> -> vector<16x128xf32>
    %7 = arith.addf %3, %6 : vector<16x128xf32>
    %c0_6 = arith.constant 0 : index
    %c0_7 = arith.constant 0 : index
    %8 = vector.load %arg7[%c0_6, %c0_7] : memref<16x128xf32, #tpu.memory_space<vmem>>, vector<16x128xf32>
    tpu.vector_store %arg7[%c0_6, %c0_7], %7 {strides = array<i32>} : memref<16x128xf32, #tpu.memory_space<vmem>>, vector<16x128xf32>,
    %c3_i32 = arith.constant 3 : i32
    %9 = arith.cmpi eq, %arg2, %c3_i32 : i32
    %10 = arith.extui %9 : i1 to i32
    %c0_i32_8 = arith.constant 0 : i32
    %11 = arith.cmpi ne, %10, %c0_i32_8 : i32
    scf.if %11 {
      %c0_9 = arith.constant 0 : index
      %c0_10 = arith.constant 0 : index
      %12 = vector.load %arg7[%c0_9, %c0_10] : memref<16x128xf32, #tpu.memory_space<vmem>>, vector<16x128xf32>
      %c0_11 = arith.constant 0 : index
      %c0_12 = arith.constant 0 : index
      %13 = vector.load %arg5[%c0_11, %c0_12] : memref<1x128xf32, #tpu.memory_space<vmem>>, vector<1x128xf32>
      %14 = vector.broadcast %13 : vector<1x128xf32> to vector<16x128xf32>
      %15 = arith.addf %12, %14 : vector<16x128xf32>
      %c0_13 = arith.constant 0 : index
      %c0_14 = arith.constant 0 : index
      %16 = vector.load %arg6[%c0_13, %c0_14] : memref<16x128xf32, #tpu.memory_space<vmem>>, vector<16x128xf32>
      tpu.vector_store %arg6[%c0_13, %c0_14], %15 {strides = array<i32>} : memref<16x128xf32, #tpu.memory_space<vmem>>, vector<16x128xf32>,
    } else {
    }
    return
  }
  func.func @transform_0(%arg0: i32, %arg1: i32, %arg2: i32) -> (i32, i32) {
    %c0_i32 = arith.constant 0 : i32
    return %arg0, %arg2 : i32, i32
  }
  func.func @transform_1(%arg0: i32, %arg1: i32, %arg2: i32) -> (i32, i32) {
    %c0_i32 = arith.constant 0 : i32
    return %arg2, %arg1 : i32, i32
  }
  func.func @transform_2(%arg0: i32, %arg1: i32, %arg2: i32) -> (i32, i32) {
    %c0_i32 = arith.constant 0 : i32
    %c0_i32_0 = arith.constant 0 : i32
    return %c0_i32, %arg1 : i32, i32
  }
  func.func @transform_3(%arg0: i32, %arg1: i32, %arg2: i32) -> (i32, i32) {
    %c0_i32 = arith.constant 0 : i32
    return %arg0, %arg1 : i32, i32
  }
}

</mosaic_0001>

<bundles_post_ra>
// kernel: _lambda_.8
= control target key start
LH: loop header
LB: loop body
LE: loop exit
PB: predicated region body
PF: predicated region fallthrough
CT: control target
= control target key end

     0   :  { %s647_s1 = inlined_call_operand.vmem [shape: bf16[128,128], index: 1, kind: input, shape index: {}]   ;;  %s648_s2 = inlined_call_operand.vmem [shape: f32[1,128], index: 2, kind: input, shape index: {}]   ;;  %s649_s0 = inlined_call_operand.vmem [shape: bf16[128,128], index: 0, kind: input, shape index: {}]   ;;  %s650_s3 = inlined_call_operand.vmem [shape: bf16[128,128], index: 3, kind: output, shape index: {}]  }
   0x1   :  { %v461_v0 = vld [vmem:[%s647_s1 + $0x38] sm:$0xff]  ;;  %v460_v1 = vld [vmem:[%s647_s1 + $0x30] sm:$0xff]  ;;  %v459_v2 = vld [vmem:[%s647_s1 + $0x28] sm:$0xff] }
   0x2   :  { %178 = vmatpush.bf16.msra.mxu0 %v461_v0  ;;  %509 = vmatpush.bf16.msra.mxu1 %v461_v0  ;;  %v458_v3 = vld [vmem:[%s647_s1 + $0x20] sm:$0xff]  ;;  %v457_v4 = vld [vmem:[%s647_s1 + $0x18] sm:$0xff]  ;;  %v456_v5 = vld [vmem:[%s647_s1 + $0x10] sm:$0xff] }
   0x3   :  { %510 = vmatpush.bf16.msra.mxu2 %v461_v0  ;;  %511 = vmatpush.bf16.msra.mxu3 %v461_v0  ;;  %v455_v6 = vld [vmem:[%s647_s1 + $0x8] sm:$0xff]  ;;  %v454_v7 = vld [vmem:[%s647_s1] sm:$0xff]  ;;  %v448_v9 = vld [vmem:[%s649_s0 + $0x10] sm:$0xff] }
   0x4   :  { %v446_v8 = vld [vmem:[%s649_s0] sm:$0xff]  ;;  %v452_v11 = vld [vmem:[%s649_s0 + $0x30] sm:$0xff]  ;;  %v447_v12 = vld [vmem:[%s649_s0 + $0x8] sm:$0xff] }
   0x5   :  { %v450_v10 = vld [vmem:[%s649_s0 + $0x20] sm:$0xff]  ;;  %v449_v13 = vld [vmem:[%s649_s0 + $0x18] sm:$0xff]  ;;  %v451_v14 = vld [vmem:[%s649_s0 + $0x28] sm:$0xff] }
   0x6   :  { %179 = vmatpush.bf16.msra.mxu0 %v460_v1  ;;  %512 = vmatpush.bf16.msra.mxu1 %v460_v1  ;;  %v453_v15 = vld [vmem:[%s649_s0 + $0x38] sm:$0xff]  ;;  %v605_v18 = vld [vmem:[%s648_s2] ss:$0 sm:$0xff] }
   0x7   :  { %513 = vmatpush.bf16.msra.mxu2 %v460_v1  ;;  %514 = vmatpush.bf16.msra.mxu3 %v460_v1 }
   0xa   :  { %180 = vmatpush.bf16.msra.mxu0 %v459_v2  ;;  %515 = vmatpush.bf16.msra.mxu1 %v459_v2 }
   0xb   :  { %516 = vmatpush.bf16.msra.mxu2 %v459_v2  ;;  %517 = vmatpush.bf16.msra.mxu3 %v459_v2 }
   0xe   :  { %181 = vmatpush.bf16.msra.mxu0 %v458_v3  ;;  %518 = vmatpush.bf16.msra.mxu1 %v458_v3 }
   0xf   :  { %519 = vmatpush.bf16.msra.mxu2 %v458_v3  ;;  %520 = vmatpush.bf16.msra.mxu3 %v458_v3 }
  0x12   :  { %182 = vmatpush.bf16.msra.mxu0 %v457_v4  ;;  %521 = vmatpush.bf16.msra.mxu1 %v457_v4 }
  0x13   :  { %522 = vmatpush.bf16.msra.mxu2 %v457_v4  ;;  %523 = vmatpush.bf16.msra.mxu3 %v457_v4 }
  0x16   :  { %183 = vmatpush.bf16.msra.mxu0 %v456_v5  ;;  %524 = vmatpush.bf16.msra.mxu1 %v456_v5 }
  0x17   :  { %525 = vmatpush.bf16.msra.mxu2 %v456_v5  ;;  %526 = vmatpush.bf16.msra.mxu3 %v456_v5 }
  0x1a   :  { %184 = vmatpush.bf16.msra.mxu0 %v455_v6  ;;  %527 = vmatpush.bf16.msra.mxu1 %v455_v6 }
  0x1b   :  { %528 = vmatpush.bf16.msra.mxu2 %v455_v6  ;;  %529 = vmatpush.bf16.msra.mxu3 %v455_v6 }
  0x1e   :  { %185 = vmatpush.bf16.msra.mxu0 %v454_v7  ;;  %530 = vmatpush.bf16.msra.mxu1 %v454_v7 }
  0x1f   :  { %531 = vmatpush.bf16.msra.mxu2 %v454_v7  ;;  %532 = vmatpush.bf16.msra.mxu3 %v454_v7 }
  0x21   :  { %186 = vmatmul.bf16.vlgmr.msra.gmra.mxu0 %v446_v8  ;;  %196 = vmatmul.bf16.vlgmr.msra.gmra.mxu1 %v448_v9 }
  0x22   :  { %206 = vmatmul.bf16.vlgmr.msra.gmra.mxu2 %v450_v10  ;;  %216 = vmatmul.bf16.vlgmr.msra.gmra.mxu3 %v452_v11 }
  0x31   :  { %191 = vmatmul.bf16.gmra.mxu0 %v447_v12  ;;  %201 = vmatmul.bf16.gmra.mxu1 %v449_v13 }
  0x32   :  { %211 = vmatmul.bf16.gmra.mxu2 %v451_v14  ;;  %221 = vmatmul.bf16.gmra.mxu3 %v453_v15 }
  0x9e   :  { %v187_v16 = vpop.f32.mrf.mxu0  ;;  %v197_v17 = vpop.f32.mrf.mxu1 }
  0x9f   :  { %v282_v19 = vadd.f32 %v605_v18, %v187_v16  ;;  %v286_v20 = vadd.f32 %v605_v18, %v197_v17 }
  0xa1   :  { %v314_v25 = vmul.f32 0.2, %v282_v19  ;;  %v318_v26 = vmul.f32 0.2, %v286_v20  ;;  %vm298_vm0 = vcmp.ge.f32.partialorder %v282_v19, 0.0  ;;  %vm302_vm1 = vcmp.ge.f32.partialorder %v286_v20, 0.0 }
  0xa3   :  { %v330_v33 = vsel %vm298_vm0, %v282_v19, %v314_v25  ;;  %v334_v34 = vsel %vm302_vm1, %v286_v20, %v318_v26 }
  0xa5   :  { %v207_v21 = vpop.f32.mrf.mxu2  ;;  %v217_v22 = vpop.f32.mrf.mxu3 }
  0xa6   :  { %v189_v23 = vpop.f32.mrf.mxu0  ;;  %v199_v24 = vpop.f32.mrf.mxu1  ;;  %v290_v31 = vadd.f32 %v605_v18, %v207_v21  ;;  %v294_v32 = vadd.f32 %v605_v18, %v217_v22 }
  0xa7   :  { %v283_v27 = vadd.f32 %v605_v18, %v189_v23  ;;  %v287_v28 = vadd.f32 %v605_v18, %v199_v24 }
  0xa8   :  { %v322_v41 = vmul.f32 0.2, %v290_v31  ;;  %v326_v42 = vmul.f32 0.2, %v294_v32  ;;  %vm306_vm4 = vcmp.ge.f32.partialorder %v290_v31, 0.0  ;;  %vm310_vm5 = vcmp.ge.f32.partialorder %v294_v32, 0.0 }
  0xa9   :  { %vm299_vm2 = vcmp.ge.f32.partialorder %v283_v27, 0.0  ;;  %v315_v29 = vmul.f32 0.2, %v283_v27  ;;  %vm303_vm3 = vcmp.ge.f32.partialorder %v287_v28, 0.0  ;;  %v319_v30 = vmul.f32 0.2, %v287_v28 }
  0xaa   :  { %v338_v49 = vsel %vm306_vm4, %v290_v31, %v322_v41  ;;  %v342_v50 = vsel %vm310_vm5, %v294_v32, %v326_v42 }
  0xab   :  { %v331_v35 = vsel %vm299_vm2, %v283_v27, %v315_v29  ;;  %v335_v36 = vsel %vm303_vm3, %v287_v28, %v319_v30 }
  0xac   :  { %v465_v37 = vpack.c.bf16 %v331_v35, %v330_v33  ;;  %v475_v38 = vpack.c.bf16 %v335_v36, %v334_v34 }
  0xad   :  { %v209_v39 = vpop.f32.mrf.mxu2  ;;  %v219_v40 = vpop.f32.mrf.mxu3 }
  0xae   :  { %466 = vst [vmem:[%s650_s3] sm:$0xff] %v465_v37   ;;  %v291_v43 = vadd.f32 %v605_v18, %v209_v39  ;;  %v295_v44 = vadd.f32 %v605_v18, %v219_v40  ;;  %v192_v45 = vpop.f32.mrf.mxu0  ;;  %v202_v46 = vpop.f32.mrf.mxu1 }
  0xaf   :  { %503 = vst [vmem:[%s650_s3 + $0x10] sm:$0xff] %v475_v38   ;;  %v284_v55 = vadd.f32 %v605_v18, %v192_v45  ;;  %v288_v56 = vadd.f32 %v605_v18, %v202_v46 }
  0xb0   :  { %vm307_vm6 = vcmp.ge.f32.partialorder %v291_v43, 0.0  ;;  %v323_v47 = vmul.f32 0.2, %v291_v43  ;;  %vm311_vm7 = vcmp.ge.f32.partialorder %v295_v44, 0.0  ;;  %v327_v48 = vmul.f32 0.2, %v295_v44 }
  0xb1   :  { %v316_v61 = vmul.f32 0.2, %v284_v55  ;;  %v320_v62 = vmul.f32 0.2, %v288_v56  ;;  %vm300_vm8 = vcmp.ge.f32.partialorder %v284_v55, 0.0  ;;  %vm304_vm9 = vcmp.ge.f32.partialorder %v288_v56, 0.0 }
  0xb2   :  { %v339_v51 = vsel %vm307_vm6, %v291_v43, %v323_v47  ;;  %v343_v52 = vsel %vm311_vm7, %v295_v44, %v327_v48 }
  0xb3   :  { %v485_v53 = vpack.c.bf16 %v339_v51, %v338_v49  ;;  %v495_v54 = vpack.c.bf16 %v343_v52, %v342_v50  ;;  %v332_v5 = vsel %vm300_vm8, %v284_v55, %v316_v61  ;;  %v336_v6 = vsel %vm304_vm9, %v288_v56, %v320_v62 }
  0xb5   :  { %505 = vst [vmem:[%s650_s3 + $0x20] sm:$0xff] %v485_v53   ;;  %v212_v57 = vpop.f32.mrf.mxu2  ;;  %v222_v58 = vpop.f32.mrf.mxu3 }
  0xb6   :  { %507 = vst [vmem:[%s650_s3 + $0x30] sm:$0xff] %v495_v54   ;;  %v194_v59 = vpop.f32.mrf.mxu0  ;;  %v204_v60 = vpop.f32.mrf.mxu1  ;;  %v292_v3 = vadd.f32 %v605_v18, %v212_v57  ;;  %v296_v4 = vadd.f32 %v605_v18, %v222_v58 }
  0xb7   :  { %v285_v63 = vadd.f32 %v605_v18, %v194_v59  ;;  %v289_v0 = vadd.f32 %v605_v18, %v204_v60 }
  0xb8   :  { %v324_v13 = vmul.f32 0.2, %v292_v3  ;;  %v328_v14 = vmul.f32 0.2, %v296_v4  ;;  %vm308_vm12 = vcmp.ge.f32.partialorder %v292_v3, 0.0  ;;  %vm312_vm13 = vcmp.ge.f32.partialorder %v296_v4, 0.0 }
  0xb9   :  { %vm301_vm10 = vcmp.ge.f32.partialorder %v285_v63, 0.0  ;;  %v317_v1 = vmul.f32 0.2, %v285_v63  ;;  %vm305_vm11 = vcmp.ge.f32.partialorder %v289_v0, 0.0  ;;  %v321_v2 = vmul.f32 0.2, %v289_v0 }
  0xba   :  { %v340_v20 = vsel %vm308_vm12, %v292_v3, %v324_v13  ;;  %v344_v21 = vsel %vm312_vm13, %v296_v4, %v328_v14 }
  0xbb   :  { %v333_v7 = vsel %vm301_vm10, %v285_v63, %v317_v1  ;;  %v337_v8 = vsel %vm305_vm11, %v289_v0, %v321_v2 }
  0xbc   :  { %v470_v9 = vpack.c.bf16 %v333_v7, %v332_v5  ;;  %v480_v10 = vpack.c.bf16 %v337_v8, %v336_v6 }
  0xbd   :  { %v214_v11 = vpop.f32.mrf.mxu2  ;;  %v224_v12 = vpop.f32.mrf.mxu3 }
  0xbe   :  { %502 = vst [vmem:[%s650_s3 + $0x8] sm:$0xff] %v470_v9   ;;  %v293_v15 = vadd.f32 %v605_v18, %v214_v11  ;;  %v297_v16 = vadd.f32 %v605_v18, %v224_v12 }
  0xbf   :  { %504 = vst [vmem:[%s650_s3 + $0x18] sm:$0xff] %v480_v10  }
  0xc0   :  { %vm309_vm14 = vcmp.ge.f32.partialorder %v293_v15, 0.0  ;;  %v325_v17 = vmul.f32 0.2, %v293_v15  ;;  %vm313_vm15 = vcmp.ge.f32.partialorder %v297_v16, 0.0  ;;  %v329_v19 = vmul.f32 0.2, %v297_v16 }
  0xc2   :  { %v341_v22 = vsel %vm309_vm14, %v293_v15, %v325_v17  ;;  %v345_v23 = vsel %vm313_vm15, %v297_v16, %v329_v19 }
  0xc3   :  { %v490_v24 = vpack.c.bf16 %v341_v22, %v340_v20  ;;  %v500_v25 = vpack.c.bf16 %v345_v23, %v344_v21 }
  0xc5   :  { %506 = vst [vmem:[%s650_s3 + $0x28] sm:$0xff] %v490_v24  }
  0xc6   :  { %508 = vst [vmem:[%s650_s3 + $0x38] sm:$0xff] %v500_v25  }

// kernel: _lambda_.11
= control target key start
LH: loop header
LB: loop body
LE: loop exit
PB: predicated region body
PF: predicated region fallthrough
CT: control target
= control target key end

     0   :  { %s461_s12 = smov 0   ;;  %s463_s13 = smov 0   ;;  %s500_s0 = inlined_call_operand.vmem [shape: bf16[2,16,128], index: 0, kind: input, shape index: {}]   ;;  %s501_s1 = inlined_call_operand.vmem [shape: f32[2,1,128], index: 1, kind: input, shape index: {}]   ;;  %s502_s2 = inlined_call_operand.vmem [shape: f32[2,1,128], index: 2, kind: input, shape index: {}]   ;;  %s503_s3 = inlined_call_operand.vmem [shape: bf16[2,16,128], index: 3, kind: output, shape index: {}]  }
   0x1   :  { %s465_s14 = smov 0  }
   0x2 LB: > { %s25_s15 = sadd.s32 1, %s435_s13  ;;  %p373_p0 = scmp.ge.s32.totalorder %s439_s14, 1  ;;  %s439_s14 = sphi %s465_s14, %s13_s14   ;;  %s435_s13 = sphi %s463_s13, %s505_s13   ;;  %s431_s12 = sphi %s461_s12, %s504_s12  }
   0x3   : > { %p27_p1 = scmp.ge.s32.totalorder %s25_s15, 2  ;;  %p174_p2 = scmp.lt.s32.totalorder %s439_s14, 3 }
   0x5   : > { %s507_s15 = smov (%p27_p1, %s25_s15), 0  ;;  %p175_p3 = pnand %p373_p0, %p174_p2 }
   0x6   : > { %p213_p4 = scmp.lt.s32.totalorder (!%p175_p3), %s431_s12, 1 }
   0x7   : > { %178 = sbr.rel (%p175_p3) target bundleno = 28 (0x1c), region = 32 }
   0xc   : > { %s509_s12 = smov (!%p213_p4, %s431_s12), 1 }
   0xd   : > { %s380_s16 = sshll.u32 %s509_s12, 3  ;;  %s224_s19 = scalar_lea.vmem %s501_s1, %s509_s12 }
   0xe   : > { %s220_s22 = scalar_lea.vmem %s500_s0, %s380_s16  ;;  %s227_s25 = scalar_lea.vmem %s502_s2, %s509_s12  ;;  %v415_v0 = vld [vmem:[%s224_s19] ss:$0 sm:$0xff] }
   0xf   : > { %v383_v1 = vld [vmem:[%s220_s22] sm:$0xff]   ;;  %s236_s28 = scalar_lea.vmem %s503_s3, %s380_s16 }
  0x10   : > { %v384_v2 = vunpack.c.l.bf16 %v383_v1  ;;  %v385_v3 = vunpack.c.h.bf16 %v383_v1  ;;  %v416_v4 = vld [vmem:[%s227_s25] ss:$0 sm:$0xff] }
  0x12   : > { %v246_v5 = vsub.f32 %v384_v2, %v415_v0  ;;  %v247_v6 = vsub.f32 %v385_v3, %v415_v0 }
  0x14   : > { %v252_v7 = vmul.f32 %v416_v4, %v246_v5  ;;  %v253_v8 = vmul.f32 %v416_v4, %v247_v6 }
  0x16   : > { %vm254_vm0 = vcmp.ge.f32.partialorder %v252_v7, 0.0  ;;  %vm255_vm1 = vcmp.ge.f32.partialorder %v253_v8, 0.0  ;;  %v256_v9 = vmul.f32 0.2, %v252_v7  ;;  %v257_v10 = vmul.f32 0.2, %v253_v8 }
  0x18   : > { %v258_v11 = vsel %vm254_vm0, %v252_v7, %v256_v9  ;;  %v259_v12 = vsel %vm255_vm1, %v253_v8, %v257_v10 }
  0x19   : > { %v389_v13 = vpack.c.bf16 %v259_v12, %v258_v11 }
  0x1b   : > { %390 = vst [vmem:[%s236_s28] sm:$0xff] %v389_v13  }
  0x1c PF: > { %s13_s14 = sadd.s32 1, %s439_s14   ;;  %s504_s12 = smov %s435_s13 }
  0x1d   : > { %p10_p5 = scmp.ge.s32.totalorder %s13_s14, 4   ;;  %s505_s13 = smov %s507_s15 }
  0x1f   :  { %12 = sbr.rel (!%p10_p5) target bundleno = 2 (0x2), region = 68 }

// kernel: _lambda_.10
= control target key start
LH: loop header
LB: loop body
LE: loop exit
PB: predicated region body
PF: predicated region fallthrough
CT: control target
= control target key end

     0   :  { %s399_s9 = smov 0   ;;  %s401_s10 = smov 0   ;;  %s449_s0 = inlined_call_operand.vmem [shape: bf16[2,16,128], index: 0, kind: input, shape index: {}]   ;;  %s450_s1 = inlined_call_operand.vmem [shape: f32[2,1,128], index: 1, kind: output, shape index: {0}]   ;;  %s451_s2 = inlined_call_operand.vmem [shape: f32[2,1,128], index: 2, kind: output, shape index: {1}]  }
   0x1   :  { %s403_s11 = smov 0  }
   0x2 LB: > { %s25_s12 = sadd.s32 1, %s377_s10  ;;  %p322_p0 = scmp.ge.s32.totalorder %s381_s11, 1  ;;  %s381_s11 = sphi %s403_s11, %s13_s11   ;;  %s377_s10 = sphi %s401_s10, %s453_s10   ;;  %s373_s9 = sphi %s399_s9, %s452_s9  }
   0x3   : > { %p27_p1 = scmp.ge.s32.totalorder %s25_s12, 2  ;;  %p134_p2 = scmp.lt.s32.totalorder %s381_s11, 3 }
   0x5   : > { %s455_s12 = smov (%p27_p1, %s25_s12), 0  ;;  %p135_p3 = pnand %p322_p0, %p134_p2 }
   0x6   : > { %p162_p4 = scmp.lt.s32.totalorder (!%p135_p3), %s373_s9, 1 }
   0x7   : > { %138 = sbr.rel (%p135_p3) target bundleno = 71 (0x47), region = 24 }
   0xc   : > { %s457_s9 = smov (!%p162_p4, %s373_s9), 1  ;;  %v383_v0 = vmov 0.0  }
   0xd   : > { %s327_s13 = sshll.u32 %s457_s9, 3  ;;  %s420_s16 = scalar_lea.vmem %s450_s1, %s457_s9 }
   0xe   : > { %s169_s19 = scalar_lea.vmem %s449_s0, %s327_s13  ;;  %181 = vst [vmem:[%s420_s16] sm:$0x1] %v383_v0  ;;  %s429_s22 = scalar_lea.vmem %s451_s2, %s457_s9 }
   0xf   : > { %v329_v1 = vld [vmem:[%s169_s19] sm:$0xff]   ;;  %182 = vst [vmem:[%s429_s22] sm:$0x1] %v383_v0 }
  0x10   : > { %v330_v2 = vunpack.c.l.bf16 %v329_v1  ;;  %v331_v3 = vunpack.c.h.bf16 %v329_v1 }
  0x12   : > { %v188_v4 = vadd.f32 %v331_v3, %v330_v2  ;;  %v198_v5 = vmul.f32 %v330_v2, %v330_v2  ;;  %v199_v6 = vmul.f32 %v331_v3, %v331_v3 }
  0x14   : > { %v189_v7 = vrot.slane %v188_v4, 4  ;;  %v200_v8 = vadd.f32 %v199_v6, %v198_v5 }
  0x15   : > { %v187_v17 = vld [vmem:[%s420_s16] sm:$0x1] }
  0x16   : > { %v190_v9 = vadd.f32 %v189_v7, %v188_v4  ;;  %v201_v10 = vrot.slane %v200_v8, 4  ;;  %v197_v20 = vld [vmem:[%s429_s22] sm:$0x1] }
  0x18   : > { %v191_v11 = vrot.slane %v190_v9, 2  ;;  %v202_v12 = vadd.f32 %v201_v10, %v200_v8 }
  0x1a   : > { %v192_v13 = vadd.f32 %v191_v11, %v190_v9  ;;  %v203_v14 = vrot.slane %v202_v12, 2 }
  0x1c   : > { %v193_v15 = vrot.slane %v192_v13, 1  ;;  %v204_v16 = vadd.f32 %v203_v14, %v202_v12 }
  0x1e   : > { %v194_v18 = vadd.f32 %v193_v15, %v192_v13  ;;  %v205_v19 = vrot.slane %v204_v16, 1 }
  0x20   : > { %v195_v21 = vadd.f32 %v194_v18, %v187_v17  ;;  %v206_v22 = vadd.f32 %v205_v19, %v204_v16 }
  0x22   : > { %196 = vst [vmem:[%s420_s16] sm:$0x1] %v195_v21  ;;  %v207_v23 = vadd.f32 %v206_v22, %v197_v20 }
  0x24   : > { %208 = vst [vmem:[%s429_s22] sm:$0x1] %v207_v23 }
  0x29   : > { %v212_v24 = vld [vmem:[%s420_s16] sm:$0x1] }
  0x2a   : > { %v213_v25 = vmul.f32 0.0625, %v212_v24 }
  0x2b   : > { %v214_v26 = vld [vmem:[%s429_s22] sm:$0x1] }
  0x2c   : > { %v216_v27 = vmul.f32 %v213_v25, %v213_v25  ;;  %219 = vst [vmem:[%s420_s16] sm:$0x1] %v213_v25  ;;  %v215_v28 = vmul.f32 0.0625, %v214_v26 }
  0x2e   : > { %v217_v29 = vsub.f32 %v215_v28, %v216_v27 }
  0x30   : > { %v218_v30 = vmax.f32 %v217_v29, 0.0 }
  0x32   : > { %v220_v31 = vadd.f32 1e-05, %v218_v30 }
  0x34   : > { %357 = vrsqrt.f32 %v220_v31  ;;  %vm227_vm1 = vweird.f32 %v220_v31 }
  0x3a   : > { %v358_v32 = vpop.eup %357 }
  0x3b   : > { %v222_v33 = vmul.f32 %v358_v32, %v220_v31  ;;  %vm228_vm0 = vweird.f32 %v358_v32 }
  0x3c   : > { %vm229_vm2 = vmor %vm227_vm1, %vm228_vm0 }
  0x3d   : > { %v223_v34 = vmul.f32 %v358_v32, %v222_v33 }
  0x3f   : > { %v224_v35 = vmul.f32 0.5, %v223_v34 }
  0x41   : > { %v225_v36 = vsub.f32 1.5, %v224_v35 }
  0x43   : > { %v226_v37 = vmul.f32 %v358_v32, %v225_v36 }
  0x45   : > { %v230_v38 = vsel %vm229_vm2, %v358_v32, %v226_v37 }
  0x46   : > { %231 = vst [vmem:[%s429_s22] sm:$0x1] %v230_v38 }
  0x47 PF: > { %s13_s11 = sadd.s32 1, %s381_s11   ;;  %s452_s9 = smov %s377_s10 }
  0x48   : > { %p10_p5 = scmp.ge.s32.totalorder %s13_s11, 4   ;;  %s453_s10 = smov %s455_s12 }
  0x4a   :  { %12 = sbr.rel (!%p10_p5) target bundleno = 2 (0x2), region = 74 }

// kernel: _lambda_.9
= control target key start
LH: loop header
LB: loop body
LE: loop exit
PB: predicated region body
PF: predicated region fallthrough
CT: control target
= control target key end

     0   :  { %s1145_s12 = smov 0   ;;  %s1147_s13 = smov 0   ;;  %s1270_s0 = inlined_call_operand.vmem [shape: bf16[32,2048], index: 0, kind: input, shape index: {}]   ;;  %s1271_s1 = inlined_call_operand.vmem [shape: bf16[2048,128], index: 1, kind: input, shape index: {}]   ;;  %s1272_s2 = inlined_call_operand.vmem [shape: f32[1,128], index: 2, kind: input, shape index: {}]   ;;  %s1273_s3 = inlined_call_operand.vmem [shape: bf16[32,128], index: 3, kind: output, shape index: {}]  }
   0x1   :  { %s1149_s14 = smov 0   ;;  %s1151_s15 = smov 0  }
   0x2   :  { %s1153_s16 = smov 0  }
   0x3 LB: > { %s25_s2 = sadd.s32 1, %s1118_s15  ;;  %p48_p1 = scmp.ne.s32.totalorder %s1110_s13, %s1106_s12  ;;  %s1122_s16 = sphi %s1153_s16, %s13_s16   ;;  %s1118_s15 = sphi %s1151_s15, %s1277_s15   ;;  %s1114_s14 = sphi %s1149_s14, %s1276_s14   ;;  %s1110_s13 = sphi %s1147_s13, %s1275_s13   ;;  %s1106_s12 = sphi %s1145_s12, %s1274_s12  }
   0x4   : > { %p26_p0 = scmp.ge.s32.totalorder %s25_s2, 4  ;;  %p49_p2 = scmp.eq.s32.totalorder %s1122_s16, 0 }
   0x5   : > { %s41_s18 = sadd.s32 1, %s1110_s13  ;;  %p817_p5 = scmp.ge.s32.totalorder %s1122_s16, 4 }
   0x6   : > { %s1279_s2 = smov (%p26_p0, %s25_s2), 0  ;;  %p50_p3 = por %p49_p2, %p48_p1 }
   0x7   : > { %s37_s17 = ssub.s32 %s1118_s15, %s1279_s2  ;;  %162 = sbr.rel (%p817_p5) target bundleno = 24 (0x18), region = 20 }
   0x8   : > { %p39_p4 = scmp.eq.s32.totalorder %s37_s17, 0 }
   0xa   : > { %s1180_s19 = scalar_select %p39_p4, %s1110_s13, %s41_s18  }
   0xc   : > { %165 = sbr.rel (!%p50_p3) target bundleno = 24 (0x18), region = 24  ;;  %s167_s20 = sand.u32 (%p50_p3), 1, %s1110_s13  }
   0xd   : > { %s991_s21 = sshll.u32 (%p50_p3), %s1118_s15, 4  ;;  %s818_s22 = sshll.u32 (%p50_p3), %s167_s20, 6 }
   0xe   : > { %s175_s25 = scalar_lea.vmem (%p50_p3), %s1270_s0, %s991_s21  ;;  %s169_s26 = scalar_lea.vmem (%p50_p3), [#allocation3], %s818_s22 }
   0xf   : > { %v188_v0 = vld [vmem:[%s175_s25] sm:$0xff] (%p50_p3)  ;;  %v190_v1 = vld [vmem:[%s175_s25 + $0x8] sm:$0xff] (%p50_p3) }
  0x10   : > { %v192_v2 = vld [vmem:[%s175_s25 + $0x40] sm:$0xff] (%p50_p3)  ;;  %189 = vst [vmem:[%s169_s26] sm:$0xff] (%p50_p3), %v188_v0  ;;  %v194_v3 = vld [vmem:[%s175_s25 + $0x48] sm:$0xff] (%p50_p3) }
  0x11   : > { %191 = vst [vmem:[%s169_s26 + $0x8] sm:$0xff] %v190_v1  ;;  %v196_v4 = vld [vmem:[%s175_s25 + $0x80] sm:$0xff]  ;;  %v198_v5 = vld [vmem:[%s175_s25 + $0x88] sm:$0xff] }
  0x12   : > { %193 = vst [vmem:[%s169_s26 + $0x10] sm:$0xff] %v192_v2  ;;  %v200_v6 = vld [vmem:[%s175_s25 + $0xc0] sm:$0xff]  ;;  %v202_v7 = vld [vmem:[%s175_s25 + $0xc8] sm:$0xff] }
  0x13   : > { %195 = vst [vmem:[%s169_s26 + $0x18] sm:$0xff] %v194_v3 }
  0x14   : > { %197 = vst [vmem:[%s169_s26 + $0x20] sm:$0xff] %v196_v4 }
  0x15   : > { %199 = vst [vmem:[%s169_s26 + $0x28] sm:$0xff] %v198_v5 }
  0x16   : > { %201 = vst [vmem:[%s169_s26 + $0x30] sm:$0xff] %v200_v6 }
  0x17   : > { %203 = vst [vmem:[%s169_s26 + $0x38] sm:$0xff] %v202_v7 }
  0x18 PF: > { %p821_p6 = scmp.ge.s32.totalorder %s1122_s16, 1  ;;  %p220_p7 = scmp.lt.s32.totalorder %s1122_s16, 5 }
  0x1a   : > { %p221_p8 = pnand %p821_p6, %p220_p7 }
  0x1b   : > { %s227_s27 = sand.u32 (!%p221_p8), 1, %s1106_s12   ;;  %s823_s28 = sshll.u32 (!%p221_p8), %s1114_s14, 6 }
  0x1c   : > { %224 = sbr.rel (%p221_p8) target bundleno = 250 (0xfa), region = 51  ;;  %s822_s29 = sshll.u32 (!%p221_p8), %s227_s27, 6 }
  0x1d   : > { %p267_p9 = scmp.lt.s32.totalorder (!%p221_p8), %s823_s28, 255  ;;  %s1197_s7 = scalar_lea.vmem (!%p221_p8), [#allocation3], %s822_s29 }
  0x1e   : > { %p825_p10 = scmp.ne.s32.totalorder (!%p221_p8), %s1114_s14, 0 }
  0x21   : > { %s1281_s28 = smov (!%p267_p9, %s823_s28), 255  ;;  %290 = sbr.rel (%p825_p10) target bundleno = 43 (0x2b), region = 59 }
  0x22   : > { %s824_s30 = sshll.u32 %s1281_s28, 2 }
  0x23   : > { %s1195_s6 = scalar_lea.vmem %s1271_s1, %s824_s30 }
  0x26   : > { %v1124_v8 = vmov 0.0  }
  0x27   : > { %291 = vst [vmem:[#allocation2 + $0x10] sm:$0xff] %v1124_v8 }
  0x28   : > { %292 = vst [vmem:[#allocation2] sm:$0xff] %v1124_v8 }
  0x29   : > { %293 = vst [vmem:[#allocation2 + $0x18] sm:$0xff] %v1124_v8 }
  0x2a   : > { %294 = vst [vmem:[#allocation2 + $0x8] sm:$0xff] %v1124_v8 }
  0x2b PF: > { %v1007_v9 = vld [vmem:[%s1195_s6 + $0x38] sm:$0xff]  ;;  %v1006_v13 = vld [vmem:[%s1195_s6 + $0x30] sm:$0xff]  ;;  %v1005_v17 = vld [vmem:[%s1195_s6 + $0x28] sm:$0xff]  ;;  %p986_p11 = scmp.ne.s32.totalorder %s1114_s14, 3 }
  0x2c   : > { %v1015_v10 = vld [vmem:[%s1195_s6 + $0x78] sm:$0xff]  ;;  %603 = vmatpush.bf16.msra.mxu0 %v1007_v9  ;;  %v1014_v14 = vld [vmem:[%s1195_s6 + $0x70] sm:$0xff]  ;;  %v1013_v18 = vld [vmem:[%s1195_s6 + $0x68] sm:$0xff] }
  0x2d   : > { %v1023_v11 = vld [vmem:[%s1195_s6 + $0xb8] sm:$0xff]  ;;  %622 = vmatpush.bf16.msra.mxu1 %v1015_v10  ;;  %v1022_v15 = vld [vmem:[%s1195_s6 + $0xb0] sm:$0xff]  ;;  %v1021_v19 = vld [vmem:[%s1195_s6 + $0xa8] sm:$0xff] }
  0x2e   : > { %v1031_v12 = vld [vmem:[%s1195_s6 + $0xf8] sm:$0xff]  ;;  %641 = vmatpush.bf16.msra.mxu2 %v1023_v11  ;;  %v1030_v16 = vld [vmem:[%s1195_s6 + $0xf0] sm:$0xff]  ;;  %v1029_v20 = vld [vmem:[%s1195_s6 + $0xe8] sm:$0xff] }
  0x2f   : > { %660 = vmatpush.bf16.msra.mxu3 %v1031_v12  ;;  %v1004_v21 = vld [vmem:[%s1195_s6 + $0x20] sm:$0xff]  ;;  %v1003_v25 = vld [vmem:[%s1195_s6 + $0x18] sm:$0xff]  ;;  %v1002_v29 = vld [vmem:[%s1195_s6 + $0x10] sm:$0xff] }
  0x30   : > { %604 = vmatpush.bf16.msra.mxu0 %v1006_v13  ;;  %v1012_v22 = vld [vmem:[%s1195_s6 + $0x60] sm:$0xff]  ;;  %v1011_v26 = vld [vmem:[%s1195_s6 + $0x58] sm:$0xff]  ;;  %v1010_v30 = vld [vmem:[%s1195_s6 + $0x50] sm:$0xff] }
  0x31   : > { %623 = vmatpush.bf16.msra.mxu1 %v1014_v14  ;;  %v1020_v23 = vld [vmem:[%s1195_s6 + $0xa0] sm:$0xff]  ;;  %v1019_v27 = vld [vmem:[%s1195_s6 + $0x98] sm:$0xff]  ;;  %v1018_v31 = vld [vmem:[%s1195_s6 + $0x90] sm:$0xff] }
  0x32   : > { %642 = vmatpush.bf16.msra.mxu2 %v1022_v15  ;;  %v1028_v24 = vld [vmem:[%s1195_s6 + $0xe0] sm:$0xff]  ;;  %v1027_v28 = vld [vmem:[%s1195_s6 + $0xd8] sm:$0xff]  ;;  %v1026_v32 = vld [vmem:[%s1195_s6 + $0xd0] sm:$0xff] }
  0x33   : > { %661 = vmatpush.bf16.msra.mxu3 %v1030_v16  ;;  %v1001_v33 = vld [vmem:[%s1195_s6 + $0x8] sm:$0xff]  ;;  %v1000_v37 = vld [vmem:[%s1195_s6] sm:$0xff]  ;;  %v994_v42 = vld [vmem:[%s1197_s7 + $0xc] sm:$0xf0] }
  0x34   : > { %605 = vmatpush.bf16.msra.mxu0 %v1005_v17  ;;  %v1009_v34 = vld [vmem:[%s1195_s6 + $0x48] sm:$0xff]  ;;  %v1008_v38 = vld [vmem:[%s1195_s6 + $0x40] sm:$0xff]  ;;  %v830_v44 = vld [vmem:[%s1197_s7 + $0x10] sm:$0xf0] }
  0x35   : > { %624 = vmatpush.bf16.msra.mxu1 %v1013_v18  ;;  %v1017_v35 = vld [vmem:[%s1195_s6 + $0x88] sm:$0xff]  ;;  %v1016_v39 = vld [vmem:[%s1195_s6 + $0x80] sm:$0xff]  ;;  %v995_v46 = vld [vmem:[%s1197_s7 + $0x14] sm:$0xf0] }
  0x36   : > { %643 = vmatpush.bf16.msra.mxu2 %v1021_v19  ;;  %v1025_v36 = vld [vmem:[%s1195_s6 + $0xc8] sm:$0xff]  ;;  %v1024_v40 = vld [vmem:[%s1195_s6 + $0xc0] sm:$0xff]  ;;  %v838_v48 = vld [vmem:[%s1197_s7 + $0x18] sm:$0xf0] }
  0x37   : > { %662 = vmatpush.bf16.msra.mxu3 %v1029_v20  ;;  %v828_v41 = vld [vmem:[%s1197_s7] sm:$0xf]  ;;  %v992_v43 = vld [vmem:[%s1197_s7 + $0x4] sm:$0xf]  ;;  %v836_v45 = vld [vmem:[%s1197_s7 + $0x8] sm:$0xf] }
  0x38   : > { %606 = vmatpush.bf16.msra.mxu0 %v1004_v21  ;;  %v993_v47 = vld [vmem:[%s1197_s7 + $0xc] sm:$0xf]  ;;  %v829_v49 = vor.u32 %v994_v42, %v828_v41  ;;  %v833_v50 = vor.u32 %v992_v43, %v830_v44  ;;  %v837_v51 = vor.u32 %v995_v46, %v836_v45  ;;  %v844_v53 = vld [vmem:[%s1197_s7 + $0x20] sm:$0xf]  ;;  %v998_v54 = vld [vmem:[%s1197_s7 + $0x2c] sm:$0xf0] }
  0x39   : > { %625 = vmatpush.bf16.msra.mxu1 %v1012_v22  ;;  %v841_v52 = vor.u32 %v993_v47, %v838_v48  ;;  %v996_v55 = vld [vmem:[%s1197_s7 + $0x24] sm:$0xf]  ;;  %v846_v56 = vld [vmem:[%s1197_s7 + $0x30] sm:$0xf0]  ;;  %v852_v57 = vld [vmem:[%s1197_s7 + $0x28] sm:$0xf]  ;;  %v845_v61 = vor.u32 %v998_v54, %v844_v53 }
  0x3a   : > { %644 = vmatpush.bf16.msra.mxu2 %v1020_v23  ;;  %v999_v58 = vld [vmem:[%s1197_s7 + $0x34] sm:$0xf0]  ;;  %v997_v59 = vld [vmem:[%s1197_s7 + $0x2c] sm:$0xf]  ;;  %v854_v60 = vld [vmem:[%s1197_s7 + $0x38] sm:$0xf0]  ;;  %v849_v62 = vor.u32 %v996_v55, %v846_v56 }
  0x3b   : > { %663 = vmatpush.bf16.msra.mxu3 %v1028_v24  ;;  %v853_v63 = vor.u32 %v999_v58, %v852_v57  ;;  %v857_v0 = vor.u32 %v997_v59, %v854_v60  ;;  %v295_v9 = vld [vmem:[#allocation2 + $0x10] sm:$0xff]  ;;  %v296_v16 = vld [vmem:[#allocation2] sm:$0xff] }
  0x3c   : > { %607 = vmatpush.bf16.msra.mxu0 %v1003_v25  ;;  %v297_v25 = vld [vmem:[#allocation2 + $0x18] sm:$0xff] }
  0x3d   : > { %626 = vmatpush.bf16.msra.mxu1 %v1011_v26 }
  0x3e   : > { %645 = vmatpush.bf16.msra.mxu2 %v1019_v27 }
  0x3f   : > { %664 = vmatpush.bf16.msra.mxu3 %v1027_v28 }
  0x40   : > { %608 = vmatpush.bf16.msra.mxu0 %v1002_v29 }
  0x41   : > { %627 = vmatpush.bf16.msra.mxu1 %v1010_v30 }
  0x42   : > { %646 = vmatpush.bf16.msra.mxu2 %v1018_v31 }
  0x43   : > { %665 = vmatpush.bf16.msra.mxu3 %v1026_v32 }
  0x44   : > { %609 = vmatpush.bf16.msra.mxu0 %v1001_v33  ;;  %v298_v33 = vld [vmem:[#allocation2 + $0x8] sm:$0xff] }
  0x45   : > { %628 = vmatpush.bf16.msra.mxu1 %v1009_v34 }
  0x46   : > { %647 = vmatpush.bf16.msra.mxu2 %v1017_v35 }
  0x47   : > { %666 = vmatpush.bf16.msra.mxu3 %v1025_v36 }
  0x48   : > { %610 = vmatpush.bf16.msra.mxu0 %v1000_v37 }
  0x49   : > { %629 = vmatpush.bf16.msra.mxu1 %v1008_v38 }
  0x4a   : > { %648 = vmatpush.bf16.msra.mxu2 %v1016_v39 }
  0x4b   : > { %667 = vmatpush.bf16.msra.mxu3 %v1024_v40  ;;  %611 = vmatmul.bf16.vlgmr.msra.gmra.mxu0 %v829_v49 }
  0x4c   : > { %630 = vmatmul.bf16.vlgmr.msra.gmra.mxu1 %v833_v50 }
  0x4d   : > { %649 = vmatmul.bf16.vlgmr.msra.gmra.mxu2 %v837_v51 }
  0x4e   : > { %668 = vmatmul.bf16.vlgmr.msra.gmra.mxu3 %v841_v52 }
  0x5b   : > { %616 = vmatmul.bf16.gmra.mxu0 %v845_v61 }
  0x5c   : > { %635 = vmatmul.bf16.gmra.mxu1 %v849_v62 }
  0x5d   : > { %654 = vmatmul.bf16.gmra.mxu2 %v853_v63 }
  0x5e   : > { %673 = vmatmul.bf16.gmra.mxu3 %v857_v0 }
  0xc8   : > { %v612_v1 = vpop.f32.mrf.mxu0 }
  0xc9   : > { %v631_v2 = vpop.f32.mrf.mxu1 }
  0xca   : > { %v632_v3 = vadd.f32 %v631_v2, %v612_v1 }
  0xd0   : > { %v650_v4 = vpop.f32.mrf.mxu2  ;;  %v614_v7 = vpop.f32.mrf.mxu0 }
  0xd1   : > { %v669_v5 = vpop.f32.mrf.mxu3  ;;  %v651_v6 = vadd.f32 %v650_v4, %v632_v3  ;;  %v633_v8 = vpop.f32.mrf.mxu1 }
  0xd2   : > { %v634_v12 = vadd.f32 %v633_v8, %v614_v7 }
  0xd3   : > { %v670_v10 = vadd.f32 %v669_v5, %v651_v6 }
  0xd5   : > { %v679_v11 = vadd.f32 %v670_v10, %v295_v9 }
  0xd7   : > { %683 = vst [vmem:[#allocation2 + $0x10] sm:$0xff] %v679_v11 }
  0xd8   : > { %v652_v13 = vpop.f32.mrf.mxu2  ;;  %v617_v17 = vpop.f32.mrf.mxu0 }
  0xd9   : > { %v671_v14 = vpop.f32.mrf.mxu3  ;;  %v653_v15 = vadd.f32 %v652_v13, %v634_v12  ;;  %v636_v18 = vpop.f32.mrf.mxu1 }
  0xda   : > { %v637_v21 = vadd.f32 %v636_v18, %v617_v17 }
  0xdb   : > { %v672_v19 = vadd.f32 %v671_v14, %v653_v15 }
  0xdd   : > { %v680_v20 = vadd.f32 %v672_v19, %v296_v16 }
  0xdf   : > { %684 = vst [vmem:[#allocation2] sm:$0xff] %v680_v20 }
  0xe0   : > { %v655_v22 = vpop.f32.mrf.mxu2  ;;  %v619_v27 = vpop.f32.mrf.mxu0 }
  0xe1   : > { %v674_v23 = vpop.f32.mrf.mxu3  ;;  %v656_v24 = vadd.f32 %v655_v22, %v637_v21  ;;  %v638_v28 = vpop.f32.mrf.mxu1 }
  0xe2   : > { %v639_v30 = vadd.f32 %v638_v28, %v619_v27 }
  0xe3   : > { %v675_v26 = vadd.f32 %v674_v23, %v656_v24 }
  0xe5   : > { %v681_v29 = vadd.f32 %v675_v26, %v297_v25 }
  0xe7   : > { %685 = vst [vmem:[#allocation2 + $0x18] sm:$0xff] %v681_v29 }
  0xe8   : > { %v657_v31 = vpop.f32.mrf.mxu2 }
  0xe9   : > { %v658_v32 = vadd.f32 %v657_v31, %v639_v30  ;;  %v676_v34 = vpop.f32.mrf.mxu3 }
  0xeb   : > { %v677_v35 = vadd.f32 %v676_v34, %v658_v32  ;;  %690 = sbr.rel (%p986_p11) target bundleno = 250 (0xfa), region = 63 }
  0xed   : > { %v682_v36 = vadd.f32 %v677_v35, %v298_v33 }
  0xef   : > { %686 = vst [vmem:[#allocation2 + $0x8] sm:$0xff] %v682_v36 }
  0xf0   : > { %v691_v37 = vld [vmem:[#allocation2 + $0x10] sm:$0xff]  ;;  %v692_v38 = vld [vmem:[#allocation2] sm:$0xff]  ;;  %v693_v39 = vld [vmem:[#allocation2 + $0x18] sm:$0xff] }
  0xf1   : > { %v1035_v40 = vpack.c.bf16 %v692_v38, %v691_v37 }
  0xf3   : > { %1036 = vst [vmem:[%s1273_s3] sm:$0xff] %v1035_v40  }
  0xf6   : > { %v694_v41 = vld [vmem:[#allocation2 + $0x8] sm:$0xff] }
  0xf7   : > { %v1040_v42 = vpack.c.bf16 %v694_v41, %v693_v39 }
  0xf9   : > { %1042 = vst [vmem:[%s1273_s3 + $0x8] sm:$0xff] %v1040_v42  }
  0xfa PF: > { %s13_s16 = sadd.s32 1, %s1122_s16   ;;  %s1274_s12 = smov %s1110_s13 }
  0xfb   : > { %p10_p12 = scmp.ge.s32.totalorder %s13_s16, 6   ;;  %s1275_s13 = smov %s1180_s19 }
  0xfc   : > { %s1276_s14 = smov %s1118_s15  ;;  %s1277_s15 = smov %s1279_s2 }
  0xfd   :  { %12 = sbr.rel (!%p10_p12) target bundleno = 3 (0x3), region = 104 }

// kernel: _lambda_.13
= control target key start
LH: loop header
LB: loop body
LE: loop exit
PB: predicated region body
PF: predicated region fallthrough
CT: control target
= control target key end

     0   :  { %s399_s9 = smov 0   ;;  %s401_s10 = smov 0   ;;  %s449_s0 = inlined_call_operand.vmem [shape: bf16[2,16,128], index: 0, kind: input, shape index: {}]   ;;  %s450_s1 = inlined_call_operand.vmem [shape: f32[2,1,128], index: 1, kind: output, shape index: {0}]   ;;  %s451_s2 = inlined_call_operand.vmem [shape: f32[2,1,128], index: 2, kind: output, shape index: {1}]  }
   0x1   :  { %s403_s11 = smov 0  }
   0x2 LB: > { %s25_s12 = sadd.s32 1, %s377_s10  ;;  %p322_p0 = scmp.ge.s32.totalorder %s381_s11, 1  ;;  %s381_s11 = sphi %s403_s11, %s13_s11   ;;  %s377_s10 = sphi %s401_s10, %s453_s10   ;;  %s373_s9 = sphi %s399_s9, %s452_s9  }
   0x3   : > { %p27_p1 = scmp.ge.s32.totalorder %s25_s12, 2  ;;  %p134_p2 = scmp.lt.s32.totalorder %s381_s11, 3 }
   0x5   : > { %s455_s12 = smov (%p27_p1, %s25_s12), 0  ;;  %p135_p3 = pnand %p322_p0, %p134_p2 }
   0x6   : > { %p162_p4 = scmp.lt.s32.totalorder (!%p135_p3), %s373_s9, 1 }
   0x7   : > { %138 = sbr.rel (%p135_p3) target bundleno = 71 (0x47), region = 24 }
   0xc   : > { %s457_s9 = smov (!%p162_p4, %s373_s9), 1  ;;  %v383_v0 = vmov 0.0  }
   0xd   : > { %s327_s13 = sshll.u32 %s457_s9, 3  ;;  %s420_s16 = scalar_lea.vmem %s450_s1, %s457_s9 }
   0xe   : > { %s169_s19 = scalar_lea.vmem %s449_s0, %s327_s13  ;;  %181 = vst [vmem:[%s420_s16] sm:$0x1] %v383_v0  ;;  %s429_s22 = scalar_lea.vmem %s451_s2, %s457_s9 }
   0xf   : > { %v329_v1 = vld [vmem:[%s169_s19] sm:$0xff]   ;;  %182 = vst [vmem:[%s429_s22] sm:$0x1] %v383_v0 }
  0x10   : > { %v330_v2 = vunpack.c.l.bf16 %v329_v1  ;;  %v331_v3 = vunpack.c.h.bf16 %v329_v1 }
  0x12   : > { %v188_v4 = vadd.f32 %v331_v3, %v330_v2  ;;  %v198_v5 = vmul.f32 %v330_v2, %v330_v2  ;;  %v199_v6 = vmul.f32 %v331_v3, %v331_v3 }
  0x14   : > { %v189_v7 = vrot.slane %v188_v4, 4  ;;  %v200_v8 = vadd.f32 %v199_v6, %v198_v5 }
  0x15   : > { %v187_v17 = vld [vmem:[%s420_s16] sm:$0x1] }
  0x16   : > { %v190_v9 = vadd.f32 %v189_v7, %v188_v4  ;;  %v201_v10 = vrot.slane %v200_v8, 4  ;;  %v197_v20 = vld [vmem:[%s429_s22] sm:$0x1] }
  0x18   : > { %v191_v11 = vrot.slane %v190_v9, 2  ;;  %v202_v12 = vadd.f32 %v201_v10, %v200_v8 }
  0x1a   : > { %v192_v13 = vadd.f32 %v191_v11, %v190_v9  ;;  %v203_v14 = vrot.slane %v202_v12, 2 }
  0x1c   : > { %v193_v15 = vrot.slane %v192_v13, 1  ;;  %v204_v16 = vadd.f32 %v203_v14, %v202_v12 }
  0x1e   : > { %v194_v18 = vadd.f32 %v193_v15, %v192_v13  ;;  %v205_v19 = vrot.slane %v204_v16, 1 }
  0x20   : > { %v195_v21 = vadd.f32 %v194_v18, %v187_v17  ;;  %v206_v22 = vadd.f32 %v205_v19, %v204_v16 }
  0x22   : > { %196 = vst [vmem:[%s420_s16] sm:$0x1] %v195_v21  ;;  %v207_v23 = vadd.f32 %v206_v22, %v197_v20 }
  0x24   : > { %208 = vst [vmem:[%s429_s22] sm:$0x1] %v207_v23 }
  0x29   : > { %v212_v24 = vld [vmem:[%s420_s16] sm:$0x1] }
  0x2a   : > { %v213_v25 = vmul.f32 0.11111111, %v212_v24 }
  0x2b   : > { %v214_v26 = vld [vmem:[%s429_s22] sm:$0x1] }
  0x2c   : > { %v216_v27 = vmul.f32 %v213_v25, %v213_v25  ;;  %219 = vst [vmem:[%s420_s16] sm:$0x1] %v213_v25  ;;  %v215_v28 = vmul.f32 0.11111111, %v214_v26 }
  0x2e   : > { %v217_v29 = vsub.f32 %v215_v28, %v216_v27 }
  0x30   : > { %v218_v30 = vmax.f32 %v217_v29, 0.0 }
  0x32   : > { %v220_v31 = vadd.f32 1e-05, %v218_v30 }
  0x34   : > { %357 = vrsqrt.f32 %v220_v31  ;;  %vm227_vm1 = vweird.f32 %v220_v31 }
  0x3a   : > { %v358_v32 = vpop.eup %357 }
  0x3b   : > { %v222_v33 = vmul.f32 %v358_v32, %v220_v31  ;;  %vm228_vm0 = vweird.f32 %v358_v32 }
  0x3c   : > { %vm229_vm2 = vmor %vm227_vm1, %vm228_vm0 }
  0x3d   : > { %v223_v34 = vmul.f32 %v358_v32, %v222_v33 }
  0x3f   : > { %v224_v35 = vmul.f32 0.5, %v223_v34 }
  0x41   : > { %v225_v36 = vsub.f32 1.5, %v224_v35 }
  0x43   : > { %v226_v37 = vmul.f32 %v358_v32, %v225_v36 }
  0x45   : > { %v230_v38 = vsel %vm229_vm2, %v358_v32, %v226_v37 }
  0x46   : > { %231 = vst [vmem:[%s429_s22] sm:$0x1] %v230_v38 }
  0x47 PF: > { %s13_s11 = sadd.s32 1, %s381_s11   ;;  %s452_s9 = smov %s377_s10 }
  0x48   : > { %p10_p5 = scmp.ge.s32.totalorder %s13_s11, 4   ;;  %s453_s10 = smov %s455_s12 }
  0x4a   :  { %12 = sbr.rel (!%p10_p5) target bundleno = 2 (0x2), region = 74 }

// kernel: _lambda_.15
= control target key start
LH: loop header
LB: loop body
LE: loop exit
PB: predicated region body
PF: predicated region fallthrough
CT: control target
= control target key end

     0   :  { %s1053_s12 = smov 0   ;;  %s1055_s13 = smov 0   ;;  %s1173_s0 = inlined_call_operand.vmem [shape: bf16[16,2048], index: 0, kind: input, shape index: {}]   ;;  %s1174_s1 = inlined_call_operand.vmem [shape: bf16[2048,128], index: 1, kind: input, shape index: {}]   ;;  %s1175_s2 = inlined_call_operand.vmem [shape: f32[1,128], index: 2, kind: input, shape index: {}]   ;;  %s1176_s3 = inlined_call_operand.vmem [shape: f32[16,128], index: 3, kind: output, shape index: {}]  }
   0x1   :  { %s1057_s14 = smov 0   ;;  %s1059_s15 = smov 0  }
   0x2   :  { %s1061_s16 = smov 0  }
   0x3 LB: > { %s25_s17 = sadd.s32 1, %s1026_s15  ;;  %p48_p1 = scmp.ne.s32.totalorder %s1018_s13, %s1014_s12  ;;  %s1030_s16 = sphi %s1061_s16, %s13_s16   ;;  %s1026_s15 = sphi %s1059_s15, %s1180_s15   ;;  %s1022_s14 = sphi %s1057_s14, %s1179_s14   ;;  %s1018_s13 = sphi %s1055_s13, %s1178_s13   ;;  %s1014_s12 = sphi %s1053_s12, %s1177_s12  }
   0x4   : > { %p26_p0 = scmp.ge.s32.totalorder %s25_s17, 4  ;;  %p49_p2 = scmp.eq.s32.totalorder %s1030_s16, 0 }
   0x5   : > { %s41_s19 = sadd.s32 1, %s1018_s13  ;;  %p755_p5 = scmp.ge.s32.totalorder %s1030_s16, 4 }
   0x6   : > { %s1182_s17 = smov (%p26_p0, %s25_s17), 0  ;;  %p50_p3 = por %p49_p2, %p48_p1 }
   0x7   : > { %s37_s18 = ssub.s32 %s1026_s15, %s1182_s17  ;;  %162 = sbr.rel (%p755_p5) target bundleno = 20 (0x14), region = 20 }
   0x8   : > { %p39_p4 = scmp.eq.s32.totalorder %s37_s18, 0 }
   0xa   : > { %s1088_s20 = scalar_select %p39_p4, %s1018_s13, %s41_s19  }
   0xc   : > { %165 = sbr.rel (!%p50_p3) target bundleno = 20 (0x14), region = 24  ;;  %s167_s21 = sand.u32 (%p50_p3), 1, %s1018_s13  }
   0xd   : > { %s913_s22 = sshll.u32 (%p50_p3), %s1026_s15, 4  ;;  %s756_s23 = sshll.u32 (%p50_p3), %s167_s21, 5 }
   0xe   : > { %s175_s26 = scalar_lea.vmem (%p50_p3), %s1173_s0, %s913_s22  ;;  %s169_s27 = scalar_lea.vmem (%p50_p3), [#allocation3], %s756_s23 }
   0xf   : > { %v188_v0 = vld [vmem:[%s175_s26] sm:$0xff] (%p50_p3)  ;;  %v190_v1 = vld [vmem:[%s175_s26 + $0x8] sm:$0xff] (%p50_p3) }
  0x10   : > { %v192_v2 = vld [vmem:[%s175_s26 + $0x40] sm:$0xff] (%p50_p3)  ;;  %189 = vst [vmem:[%s169_s27] sm:$0xff] (%p50_p3), %v188_v0  ;;  %v194_v3 = vld [vmem:[%s175_s26 + $0x48] sm:$0xff] (%p50_p3) }
  0x11   : > { %191 = vst [vmem:[%s169_s27 + $0x8] sm:$0xff] %v190_v1 }
  0x12   : > { %193 = vst [vmem:[%s169_s27 + $0x10] sm:$0xff] %v192_v2 }
  0x13   : > { %195 = vst [vmem:[%s169_s27 + $0x18] sm:$0xff] %v194_v3 }
  0x14 PF: > { %p759_p6 = scmp.ge.s32.totalorder %s1030_s16, 1  ;;  %p212_p7 = scmp.lt.s32.totalorder %s1030_s16, 5 }
  0x16   : > { %p213_p8 = pnand %p759_p6, %p212_p7 }
  0x17   : > { %s219_s28 = sand.u32 (!%p213_p8), 1, %s1014_s12   ;;  %s761_s29 = sshll.u32 (!%p213_p8), %s1022_s14, 6 }
  0x18   : > { %216 = sbr.rel (%p213_p8) target bundleno = 228 (0xe4), region = 51  ;;  %s760_s30 = sshll.u32 (!%p213_p8), %s219_s28, 5 }
  0x19   : > { %p259_p9 = scmp.lt.s32.totalorder (!%p213_p8), %s761_s29, 255  ;;  %s1105_s8 = scalar_lea.vmem (!%p213_p8), [#allocation3], %s760_s30 }
  0x1a   : > { %p763_p10 = scmp.ne.s32.totalorder (!%p213_p8), %s1022_s14, 0 }
  0x1d   : > { %s1184_s29 = smov (!%p259_p9, %s761_s29), 255  ;;  %282 = sbr.rel (%p763_p10) target bundleno = 37 (0x25), region = 59 }
  0x1e   : > { %s762_s4 = sshll.u32 %s1184_s29, 2 }
  0x1f   : > { %s1103_s7 = scalar_lea.vmem %s1174_s1, %s762_s4 }
  0x22   : > { %v1032_v4 = vmov 0.0  }
  0x23   : > { %283 = vst [vmem:[#allocation2] sm:$0xff] %v1032_v4 }
  0x24   : > { %284 = vst [vmem:[#allocation2 + $0x8] sm:$0xff] %v1032_v4 }
  0x25 PF: > { %v925_v5 = vld [vmem:[%s1103_s7 + $0x38] sm:$0xff]  ;;  %v924_v9 = vld [vmem:[%s1103_s7 + $0x30] sm:$0xff]  ;;  %v923_v13 = vld [vmem:[%s1103_s7 + $0x28] sm:$0xff]  ;;  %p908_p11 = scmp.ne.s32.totalorder %s1022_s14, 3 }
  0x26   : > { %v933_v6 = vld [vmem:[%s1103_s7 + $0x78] sm:$0xff]  ;;  %567 = vmatpush.bf16.msra.mxu0 %v925_v5  ;;  %v932_v10 = vld [vmem:[%s1103_s7 + $0x70] sm:$0xff]  ;;  %v931_v14 = vld [vmem:[%s1103_s7 + $0x68] sm:$0xff] }
  0x27   : > { %v941_v7 = vld [vmem:[%s1103_s7 + $0xb8] sm:$0xff]  ;;  %581 = vmatpush.bf16.msra.mxu1 %v933_v6  ;;  %v940_v11 = vld [vmem:[%s1103_s7 + $0xb0] sm:$0xff]  ;;  %v939_v15 = vld [vmem:[%s1103_s7 + $0xa8] sm:$0xff] }
  0x28   : > { %v949_v8 = vld [vmem:[%s1103_s7 + $0xf8] sm:$0xff]  ;;  %595 = vmatpush.bf16.msra.mxu2 %v941_v7  ;;  %v948_v12 = vld [vmem:[%s1103_s7 + $0xf0] sm:$0xff]  ;;  %v947_v16 = vld [vmem:[%s1103_s7 + $0xe8] sm:$0xff] }
  0x29   : > { %609 = vmatpush.bf16.msra.mxu3 %v949_v8  ;;  %v922_v17 = vld [vmem:[%s1103_s7 + $0x20] sm:$0xff]  ;;  %v921_v21 = vld [vmem:[%s1103_s7 + $0x18] sm:$0xff]  ;;  %v920_v25 = vld [vmem:[%s1103_s7 + $0x10] sm:$0xff] }
  0x2a   : > { %568 = vmatpush.bf16.msra.mxu0 %v924_v9  ;;  %v930_v18 = vld [vmem:[%s1103_s7 + $0x60] sm:$0xff]  ;;  %v929_v22 = vld [vmem:[%s1103_s7 + $0x58] sm:$0xff]  ;;  %v928_v26 = vld [vmem:[%s1103_s7 + $0x50] sm:$0xff] }
  0x2b   : > { %582 = vmatpush.bf16.msra.mxu1 %v932_v10  ;;  %v938_v19 = vld [vmem:[%s1103_s7 + $0xa0] sm:$0xff]  ;;  %v937_v23 = vld [vmem:[%s1103_s7 + $0x98] sm:$0xff]  ;;  %v936_v27 = vld [vmem:[%s1103_s7 + $0x90] sm:$0xff] }
  0x2c   : > { %596 = vmatpush.bf16.msra.mxu2 %v940_v11  ;;  %v946_v20 = vld [vmem:[%s1103_s7 + $0xe0] sm:$0xff]  ;;  %v945_v24 = vld [vmem:[%s1103_s7 + $0xd8] sm:$0xff]  ;;  %v944_v28 = vld [vmem:[%s1103_s7 + $0xd0] sm:$0xff] }
  0x2d   : > { %610 = vmatpush.bf16.msra.mxu3 %v948_v12  ;;  %v919_v29 = vld [vmem:[%s1103_s7 + $0x8] sm:$0xff]  ;;  %v918_v33 = vld [vmem:[%s1103_s7] sm:$0xff]  ;;  %v766_v37 = vld [vmem:[%s1105_s8] sm:$0xf] }
  0x2e   : > { %569 = vmatpush.bf16.msra.mxu0 %v923_v13  ;;  %v927_v30 = vld [vmem:[%s1103_s7 + $0x48] sm:$0xff]  ;;  %v926_v34 = vld [vmem:[%s1103_s7 + $0x40] sm:$0xff]  ;;  %v914_v39 = vld [vmem:[%s1105_s8 + $0x4] sm:$0xf] }
  0x2f   : > { %583 = vmatpush.bf16.msra.mxu1 %v931_v14  ;;  %v935_v31 = vld [vmem:[%s1103_s7 + $0x88] sm:$0xff]  ;;  %v934_v35 = vld [vmem:[%s1103_s7 + $0x80] sm:$0xff]  ;;  %v774_v41 = vld [vmem:[%s1105_s8 + $0x8] sm:$0xf] }
  0x30   : > { %597 = vmatpush.bf16.msra.mxu2 %v939_v15  ;;  %v943_v32 = vld [vmem:[%s1103_s7 + $0xc8] sm:$0xff]  ;;  %v942_v36 = vld [vmem:[%s1103_s7 + $0xc0] sm:$0xff]  ;;  %v915_v43 = vld [vmem:[%s1105_s8 + $0xc] sm:$0xf] }
  0x31   : > { %611 = vmatpush.bf16.msra.mxu3 %v947_v16  ;;  %v916_v38 = vld [vmem:[%s1105_s8 + $0xc] sm:$0xf0]  ;;  %v768_v40 = vld [vmem:[%s1105_s8 + $0x10] sm:$0xf0]  ;;  %v917_v42 = vld [vmem:[%s1105_s8 + $0x14] sm:$0xf0] }
  0x32   : > { %570 = vmatpush.bf16.msra.mxu0 %v922_v17  ;;  %v776_v44 = vld [vmem:[%s1105_s8 + $0x18] sm:$0xf0]  ;;  %v767_v45 = vor.u32 %v916_v38, %v766_v37  ;;  %v771_v46 = vor.u32 %v914_v39, %v768_v40  ;;  %v775_v47 = vor.u32 %v917_v42, %v774_v41  ;;  %v285_v55 = vld [vmem:[#allocation2] sm:$0xff] }
  0x33   : > { %584 = vmatpush.bf16.msra.mxu1 %v930_v18  ;;  %v779_v48 = vor.u32 %v915_v43, %v776_v44  ;;  %v286_v63 = vld [vmem:[#allocation2 + $0x8] sm:$0xff] }
  0x34   : > { %598 = vmatpush.bf16.msra.mxu2 %v938_v19 }
  0x35   : > { %612 = vmatpush.bf16.msra.mxu3 %v946_v20 }
  0x36   : > { %571 = vmatpush.bf16.msra.mxu0 %v921_v21 }
  0x37   : > { %585 = vmatpush.bf16.msra.mxu1 %v929_v22 }
  0x38   : > { %599 = vmatpush.bf16.msra.mxu2 %v937_v23 }
  0x39   : > { %613 = vmatpush.bf16.msra.mxu3 %v945_v24 }
  0x3a   : > { %572 = vmatpush.bf16.msra.mxu0 %v920_v25 }
  0x3b   : > { %586 = vmatpush.bf16.msra.mxu1 %v928_v26 }
  0x3c   : > { %600 = vmatpush.bf16.msra.mxu2 %v936_v27 }
  0x3d   : > { %614 = vmatpush.bf16.msra.mxu3 %v944_v28 }
  0x3e   : > { %573 = vmatpush.bf16.msra.mxu0 %v919_v29 }
  0x3f   : > { %587 = vmatpush.bf16.msra.mxu1 %v927_v30 }
  0x40   : > { %601 = vmatpush.bf16.msra.mxu2 %v935_v31 }
  0x41   : > { %615 = vmatpush.bf16.msra.mxu3 %v943_v32 }
  0x42   : > { %574 = vmatpush.bf16.msra.mxu0 %v918_v33 }
  0x43   : > { %588 = vmatpush.bf16.msra.mxu1 %v926_v34 }
  0x44   : > { %602 = vmatpush.bf16.msra.mxu2 %v934_v35 }
  0x45   : > { %616 = vmatpush.bf16.msra.mxu3 %v942_v36  ;;  %575 = vmatmul.bf16.vlgmr.msra.gmra.mxu0 %v767_v45 }
  0x46   : > { %589 = vmatmul.bf16.vlgmr.msra.gmra.mxu1 %v771_v46 }
  0x47   : > { %603 = vmatmul.bf16.vlgmr.msra.gmra.mxu2 %v775_v47 }
  0x48   : > { %617 = vmatmul.bf16.vlgmr.msra.gmra.mxu3 %v779_v48 }
  0xc2   : > { %v576_v49 = vpop.f32.mrf.mxu0 }
  0xc3   : > { %v590_v50 = vpop.f32.mrf.mxu1 }
  0xc4   : > { %v591_v51 = vadd.f32 %v590_v50, %v576_v49 }
  0xca   : > { %v604_v52 = vpop.f32.mrf.mxu2  ;;  %v578_v57 = vpop.f32.mrf.mxu0 }
  0xcb   : > { %v618_v53 = vpop.f32.mrf.mxu3  ;;  %v605_v54 = vadd.f32 %v604_v52, %v591_v51  ;;  %v592_v58 = vpop.f32.mrf.mxu1 }
  0xcc   : > { %v593_v60 = vadd.f32 %v592_v58, %v578_v57 }
  0xcd   : > { %v619_v56 = vadd.f32 %v618_v53, %v605_v54 }
  0xcf   : > { %v623_v59 = vadd.f32 %v619_v56, %v285_v55 }
  0xd1   : > { %625 = vst [vmem:[#allocation2] sm:$0xff] %v623_v59 }
  0xd2   : > { %v606_v61 = vpop.f32.mrf.mxu2 }
  0xd3   : > { %v607_v62 = vadd.f32 %v606_v61, %v593_v60  ;;  %v620_v0 = vpop.f32.mrf.mxu3 }
  0xd5   : > { %v621_v1 = vadd.f32 %v620_v0, %v607_v62  ;;  %630 = sbr.rel (%p908_p11) target bundleno = 228 (0xe4), region = 63 }
  0xd7   : > { %v624_v2 = vadd.f32 %v621_v1, %v286_v63 }
  0xd9   : > { %626 = vst [vmem:[#allocation2 + $0x8] sm:$0xff] %v624_v2 }
  0xda   : > { %v631_v3 = vld [vmem:[#allocation2] sm:$0xff] }
  0xdb   : > { %v991_v4 = vld [vmem:[%s1175_s2] ss:$0 sm:$0xff] }
  0xdc   : > { %v637_v6 = vadd.f32 %v991_v4, %v631_v3 }
  0xde   : > { %639 = vst [vmem:[%s1176_s3] sm:$0xff] %v637_v6 }
  0xe0   : > { %v632_v5 = vld [vmem:[#allocation2 + $0x8] sm:$0xff] }
  0xe1   : > { %v638_v7 = vadd.f32 %v991_v4, %v632_v5 }
  0xe3   : > { %640 = vst [vmem:[%s1176_s3 + $0x8] sm:$0xff] %v638_v7 }
  0xe4 PF: > { %s13_s16 = sadd.s32 1, %s1030_s16   ;;  %s1177_s12 = smov %s1018_s13 }
  0xe5   : > { %p10_p12 = scmp.ge.s32.totalorder %s13_s16, 6   ;;  %s1178_s13 = smov %s1088_s20 }
  0xe6   : > { %s1179_s14 = smov %s1026_s15  ;;  %s1180_s15 = smov %s1182_s17 }
  0xe7   :  { %12 = sbr.rel (!%p10_p12) target bundleno = 3 (0x3), region = 104 }

</bundles_post_ra>
